<compile_context>
chip_gen: v6e
topology: v6e:2x2x1
jax: 0.10.0
libtpu: 0.0.40
codegen_flags: <defaults>
</compile_context>

<pallas_src>
import functools
import math
import numpy as np
import jax
import jax.numpy as jnp
from jax.experimental import pallas as pl
from jax.experimental.pallas import tpu as pltpu


# ----------------------------- model constants ------------------------------

LAYERS = ('encoder1', 'encoder2', 'encoder3', 'encoder4',
          'decoder1', 'decoder2', 'decoder3', 'decoder4', 'decoder5')


def get_number_of_coefficients(max_degree):
    # even degrees only: sum_{d=0,2,...,L} (2d+1) = (L/2+1)(L+1)
    return (max_degree // 2 + 1) * (max_degree + 1)


def make_ls(max_degree, n_coeff):
    ls = np.zeros(n_coeff, dtype=np.int32)
    for degree in range(0, max_degree + 1, 2):
        for order in range(-degree, degree + 1):
            ls[int(0.5 * degree * (degree + 1) + order)] = degree
    return jnp.asarray(ls)


def xavier_uniform(key, shape):
    # PyTorch xavier_uniform_ on (Cout, Cin, D): fan_in = Cin*D, fan_out = Cout*D
    fan_in = shape[1] * shape[2]
    fan_out = shape[0] * shape[2]
    bound = math.sqrt(6.0 / (fan_in + fan_out))
    return jax.random.uniform(key, shape, jnp.float32, -bound, bound)


def _has_two_tensorcores():
    # v7x has 2 TensorCores/chip -> keep grid=(B,) parallel; v5e/v6e are
    # single-core -> fuse the batch into sublanes instead.
    try:
        kind = jax.devices()[0].device_kind.lower()
        return ('v7' in kind) or ('7x' in kind)
    except Exception:
        return False


# ------------------------------ fused kernel ---------------------------------

def _make_kernel(dims, n_deg, k_tot, g_tot):
    """dims: per-layer (cout, cin); n_deg: #even degrees; k_tot/g_tot: SH/grid rows."""

    def kernel(x_ref, w_ref, c_ref, out_ref):
        # Constant slab layout (zero padded to (3, S, S)):
        #   c[0, :k_tot, :g_tot] = sft        (K, G)
        #   c[1, :g_tot, :k_tot] = isft       (G, K)
        #   c[2, :k_tot, :n_deg] = degree one-hot mask (K, D)
        sft = c_ref[0, :k_tot, :g_tot]
        isft = c_ref[1, :g_tot, :k_tot]
        mask = c_ref[2, :k_tot, :n_deg]

        def conv(x, layer):
            # spherical conv as ONE matmul:
            #   x_stacked[k, d*cin + c] = mask[k, d] * x[k, c]
            #   W_stacked[d*cin + c, o] = sqrt(pi/(2*2d+1)) * W[o, c, d]
            cout, cin = dims[layer]
            xs = jnp.concatenate(
                [mask[:, d:d + 1] * x for d in range(n_deg)], axis=1)   # (K, D*cin)
            w = w_ref[layer, :n_deg * cin, :cout]                       # (D*cin, cout)
            return jnp.dot(xs, w, preferred_element_type=jnp.float32)   # (K, cout)

        def nonlin(x):
            # sft @ relu(isft @ x), applied per channel column.
            g = jnp.maximum(
                jnp.dot(isft, x, preferred_element_type=jnp.float32), 0.0)
            return jnp.dot(sft, g, preferred_element_type=jnp.float32)

        x = x_ref[0]                                                    # (K, Cin0)

        e1 = nonlin(conv(x, 0))
        e2 = nonlin(conv(e1, 1))
        e3 = nonlin(conv(e2, 2))
        e4 = nonlin(conv(e3, 3))

        # Decoder: lane-concat the skip BEFORE the nonlinearity (one nonlin and
        # one full-width conv per stage).
        d1 = nonlin(jnp.concatenate([conv(e4, 4), e3], axis=1))         # (K, 128)
        d2 = nonlin(jnp.concatenate([conv(d1, 5), e2], axis=1))         # (K, 64)
        d3 = nonlin(jnp.concatenate([conv(d2, 6), e1], axis=1))         # (K, 32)
        d4 = nonlin(conv(d3, 7))                                        # (K, 16)
        out_ref[0] = conv(d4, 8)                                        # (K, Cout)

    return kernel


# --------------------------------- wrapper -----------------------------------

def unet_forward(x, params, ls, sft, isft, fuse_batch=None):
    """x: (B, Cin0, K) -> squeeze((B, Cout_last, K)), matching the PyTorch UNet."""
    B, cin0, K = x.shape
    G = isft.shape[0]
    D = params['encoder1'].shape[2]          # number of even degrees (3 for L=4)
    cout_last = params['decoder5'].shape[0]
    dims = [(int(params[n].shape[0]), int(params[n].shape[1])) for n in LAYERS]

    if fuse_batch is None:
        fuse_batch = not _has_two_tensorcores()

    # Fold sqrt(pi/(2l+1)) into per-degree slices, then stack degrees along the
    # contraction axis -> (D*Cin, Cout) per layer, packed into one padded slab.
    deg = 2.0 * jnp.arange(D, dtype=jnp.float32)
    deg_scale = jnp.sqrt(jnp.pi / (2.0 * deg + 1.0))

    w_slab = jnp.zeros((len(LAYERS), D * 128, 128), jnp.float32)
    for l, name in enumerate(LAYERS):
        w = params[name]                                    # (cout, cin, D)
        cout, cin = dims[l]
        ws = jnp.transpose(w * deg_scale[None, None, :], (2, 1, 0))  # (D, cin, cout)
        w_slab = w_slab.at[l, :D * cin, :cout].set(ws.reshape(D * cin, cout))

    if fuse_batch:
        # Batch fused into sublanes: (B*K, C) activations, block-diagonal
        # sft/isft, single grid step.  (v5e/v6e: one TensorCore anyway.)
        k_tot, g_tot, n_blocks = B * K, B * G, 1
        x_t = jnp.transpose(x, (0, 2, 1)).reshape(1, B * K, cin0)
        sft_eff = jnp.kron(jnp.eye(B, dtype=sft.dtype), sft)     # (B*K, B*G)
        isft_eff = jnp.kron(jnp.eye(B, dtype=isft.dtype), isft)  # (B*G, B*K)
        ls_eff = jnp.tile(ls, B)
    else:
        # v7x: batch elements shard across the two TensorCores via the grid.
        k_tot, g_tot, n_blocks = K, G, B
        x_t = jnp.transpose(x, (0, 2, 1))                        # (B, K, Cin0)
        sft_eff, isft_eff, ls_eff = sft, isft, ls

    # One-hot degree membership of each SH coefficient: (Ktot, D).
    mask_eff = (ls_eff[:, None] // 2 == jnp.arange(D, dtype=ls.dtype)[None, :])
    mask_eff = mask_eff.astype(jnp.float32)

    # Pack sft / isft / mask into one zero-padded constant slab.
    S = max(k_tot, g_tot, D)
    c_slab = jnp.zeros((3, S, S), jnp.float32)
    c_slab = c_slab.at[0, :k_tot, :g_tot].set(sft_eff)
    c_slab = c_slab.at[1, :g_tot, :k_tot].set(isft_eff)
    c_slab = c_slab.at[2, :k_tot, :D].set(mask_eff)

    kernel = _make_kernel(dims, D, k_tot, g_tot)

    out = pl.pallas_call(
        kernel,
        out_shape=jax.ShapeDtypeStruct((n_blocks, k_tot, cout_last), jnp.float32),
        grid_spec=pltpu.PrefetchScalarGridSpec(
            num_scalar_prefetch=0,
            grid=(n_blocks,),
            in_specs=[
                pl.BlockSpec((1, k_tot, cin0), lambda b: (b, 0, 0)),
                pl.BlockSpec(w_slab.shape, lambda b: (0, 0, 0)),
                pl.BlockSpec(c_slab.shape, lambda b: (0, 0, 0)),
            ],
            out_specs=pl.BlockSpec((1, k_tot, cout_last), lambda b: (b, 0, 0)),
        ),
        compiler_params=pltpu.CompilerParams(
            dimension_semantics=("parallel",) if n_blocks > 1 else ("arbitrary",),
        ),
    )(x_t, w_slab, c_slab)

    out = out.reshape(B, K, cout_last)
    return jnp.squeeze(jnp.transpose(out, (0, 2, 1)))


# ------------------------- pure-JAX reference (check) -------------------------

def _ref_conv(x, w, ls):
    scale = jnp.sqrt(jnp.pi / (2.0 * ls.astype(jnp.float32) + 1.0))
    w_eff = w[:, :, ls // 2] * scale[None, None, :]
    return jnp.sum(w_eff[None] * x[:, None], axis=2)


def _ref_nonlin(x, sft, isft):
    g = jnp.einsum('gk,bck->bcg', isft, x)
    g = jnp.maximum(g, 0.0)
    return jnp.einsum('kg,bcg->bck', sft, g)


def unet_forward_ref(x, params, ls, sft, isft):
    e1 = _ref_nonlin(_ref_conv(x, params['encoder1'], ls), sft, isft)
    e2 = _ref_nonlin(_ref_conv(e1, params['encoder2'], ls), sft, isft)
    e3 = _ref_nonlin(_ref_conv(e2, params['encoder3'], ls), sft, isft)
    e4 = _ref_nonlin(_ref_conv(e3, params['encoder4'], ls), sft, isft)
    d1 = _ref_conv(e4, params['decoder1'], ls)
    d1 = _ref_nonlin(jnp.concatenate([d1, e3], axis=1), sft, isft)
    d2 = _ref_conv(d1, params['decoder2'], ls)
    d2 = _ref_nonlin(jnp.concatenate([d2, e2], axis=1), sft, isft)
    d3 = _ref_conv(d2, params['decoder3'], ls)
    d3 = _ref_nonlin(jnp.concatenate([d3, e1], axis=1), sft, isft)
    d4 = _ref_nonlin(_ref_conv(d3, params['decoder4'], ls), sft, isft)
    d5 = _ref_conv(d4, params['decoder5'], ls)
    return jnp.squeeze(d5)


# ----------------------------------- main -------------------------------------

if __name__ == "__main__":
    B = 2
    number_of_shells = 4
    output_size = 8
    max_degree = 4
    K = get_number_of_coefficients(max_degree)   # 15 SH coefficients
    G = 32                                       # sphere grid points
    D = max_degree // 2 + 1                      # 3 per-degree weights

    ls = make_ls(max_degree, K)

    layer_channels = {
        'encoder1': (16, number_of_shells),
        'encoder2': (32, 16),
        'encoder3': (64, 32),
        'encoder4': (128, 64),
        'decoder1': (64, 128),
        'decoder2': (32, 128),
        'decoder3': (16, 64),
        'decoder4': (16, 32),
        'decoder5': (output_size, 16),
    }

    key = jax.random.PRNGKey(0)
    keys = jax.random.split(key, len(layer_channels) + 3)
    params = {}
    for i, (name, (cout, cin)) in enumerate(layer_channels.items()):
        params[name] = xavier_uniform(keys[i], (cout, cin, D))

    sft = 0.1 * jax.random.normal(keys[-3], (K, G), jnp.float32)    # (K, G)
    isft = 0.1 * jax.random.normal(keys[-2], (G, K), jnp.float32)   # (G, K)
    x = jax.random.normal(keys[-1], (B, number_of_shells, K), jnp.float32)

    ref = np.asarray(jax.block_until_ready(
        unet_forward_ref(x, params, ls, sft, isft)))

    # Run the auto-selected layout (v7x: per-core batch grid; v5e/v6e: batch
    # fused into sublanes) and also exercise the other path for coverage.
    for fuse in (None, True, False):
        fwd = jax.jit(functools.partial(
            unet_forward, params=params, ls=ls, sft=sft, isft=isft,
            fuse_batch=fuse))
        out = np.asarray(jax.block_until_ready(fwd(x)))
        assert out.shape == ref.shape, (out.shape, ref.shape)
        np.testing.assert_allclose(out, ref, rtol=5e-3, atol=5e-3)

    print("KERNEL_OK")
</pallas_src>

<mosaic_0001>
module attributes {stable_mosaic.version = 11 : i64} {
  func.func @kernel(%arg0: i32, %arg1: memref<1x30x4xf32, #tpu.memory_space<vmem>>, %arg2: memref<9x384x128xf32, #tpu.memory_space<vmem>>, %arg3: memref<3x64x64xf32, #tpu.memory_space<vmem>>, %arg4: memref<1x30x8xf32, #tpu.memory_space<vmem>>) attributes {dimension_semantics = [#tpu.dimension_semantics<arbitrary>], iteration_bounds = array<i64: 1>, scalar_prefetch = 0 : i64, scratch_operands = 0 : i64, tpu.core_type = #tpu.core_type<tc>, window_params = [{transform_indices = @transform_0, window_bounds = array<i64: 1, 30, 4>}, {pipeline_mode = #tpu.pipeline_mode<synchronous>, transform_indices = @transform_1, window_bounds = array<i64: 9, 384, 128>}, {pipeline_mode = #tpu.pipeline_mode<synchronous>, transform_indices = @transform_2, window_bounds = array<i64: 3, 64, 64>}, {transform_indices = @transform_3, window_bounds = array<i64: 1, 30, 8>}]} {
    %c0 = arith.constant 0 : index
    %c0_0 = arith.constant 0 : index
    %c0_1 = arith.constant 0 : index
    %0 = vector.load %arg3[%c0, %c0_0, %c0_1] : memref<3x64x64xf32, #tpu.memory_space<vmem>>, vector<1x30x64xf32>
    %1 = vector.shape_cast %0 : vector<1x30x64xf32> to vector<30x64xf32>
    %c1 = arith.constant 1 : index
    %c0_2 = arith.constant 0 : index
    %c0_3 = arith.constant 0 : index
    %2 = vector.load %arg3[%c1, %c0_2, %c0_3] : memref<3x64x64xf32, #tpu.memory_space<vmem>>, vector<1x64x30xf32>
    %3 = vector.shape_cast %2 : vector<1x64x30xf32> to vector<64x30xf32>
    %c2 = arith.constant 2 : index
    %c0_4 = arith.constant 0 : index
    %c0_5 = arith.constant 0 : index
    %4 = vector.load %arg3[%c2, %c0_4, %c0_5] : memref<3x64x64xf32, #tpu.memory_space<vmem>>, vector<1x30x3xf32>
    %5 = vector.shape_cast %4 : vector<1x30x3xf32> to vector<30x3xf32>
    %c0_6 = arith.constant 0 : index
    %c0_7 = arith.constant 0 : index
    %c0_8 = arith.constant 0 : index
    %6 = vector.load %arg1[%c0_6, %c0_7, %c0_8] : memref<1x30x4xf32, #tpu.memory_space<vmem>>, vector<1x30x4xf32>
    %7 = vector.shape_cast %6 : vector<1x30x4xf32> to vector<30x4xf32>
    %8 = vector.extract_strided_slice %5 {offsets = [0, 0], sizes = [30, 1], strides = [1, 1]} : vector<30x3xf32> to vector<30x1xf32>
    %9 = vector.broadcast %8 : vector<30x1xf32> to vector<30x4xf32>
    %10 = arith.mulf %9, %7 : vector<30x4xf32>
    %11 = vector.extract_strided_slice %5 {offsets = [0, 1], sizes = [30, 1], strides = [1, 1]} : vector<30x3xf32> to vector<30x1xf32>
    %12 = vector.broadcast %11 : vector<30x1xf32> to vector<30x4xf32>
    %13 = arith.mulf %12, %7 : vector<30x4xf32>
    %14 = vector.extract_strided_slice %5 {offsets = [0, 2], sizes = [30, 1], strides = [1, 1]} : vector<30x3xf32> to vector<30x1xf32>
    %15 = vector.broadcast %14 : vector<30x1xf32> to vector<30x4xf32>
    %16 = arith.mulf %15, %7 : vector<30x4xf32>
    %17 = tpu.concatenate %10, %13, %16 in 1 : vector<30x4xf32>, vector<30x4xf32>, vector<30x4xf32> -> vector<30x12xf32>
    %c0_9 = arith.constant 0 : index
    %c0_10 = arith.constant 0 : index
    %c0_11 = arith.constant 0 : index
    %18 = vector.load %arg2[%c0_9, %c0_10, %c0_11] : memref<9x384x128xf32, #tpu.memory_space<vmem>>, vector<1x12x16xf32>
    %19 = vector.shape_cast %18 : vector<1x12x16xf32> to vector<12x16xf32>
    %cst = arith.constant dense<0.000000e+00> : vector<30x16xf32>
    %20 = tpu.matmul %17, %19, %cst {dimension_numbers = #tpu.dot_dimension_numbers<[1], [0], [0], [1], [0, 0, 1, 1], [], []>} : vector<30x12xf32>, vector<12x16xf32>, vector<30x16xf32> -> vector<30x16xf32>
    %cst_12 = arith.constant dense<0.000000e+00> : vector<64x16xf32>
    %21 = tpu.matmul %3, %20, %cst_12 {dimension_numbers = #tpu.dot_dimension_numbers<[1], [0], [0], [1], [0, 0, 1, 1], [], []>} : vector<64x30xf32>, vector<30x16xf32>, vector<64x16xf32> -> vector<64x16xf32>
    %cst_13 = arith.constant 0.000000e+00 : f32
    %22 = vector.broadcast %cst_13 : f32 to vector<64x16xf32>
    %23 = arith.maximumf %21, %22 : vector<64x16xf32>
    %cst_14 = arith.constant dense<0.000000e+00> : vector<30x16xf32>
    %24 = tpu.matmul %1, %23, %cst_14 {dimension_numbers = #tpu.dot_dimension_numbers<[1], [0], [0], [1], [0, 0, 1, 1], [], []>} : vector<30x64xf32>, vector<64x16xf32>, vector<30x16xf32> -> vector<30x16xf32>
    %25 = vector.extract_strided_slice %5 {offsets = [0, 0], sizes = [30, 1], strides = [1, 1]} : vector<30x3xf32> to vector<30x1xf32>
    %26 = vector.broadcast %25 : vector<30x1xf32> to vector<30x16xf32>
    %27 = arith.mulf %26, %24 : vector<30x16xf32>
    %28 = vector.extract_strided_slice %5 {offsets = [0, 1], sizes = [30, 1], strides = [1, 1]} : vector<30x3xf32> to vector<30x1xf32>
    %29 = vector.broadcast %28 : vector<30x1xf32> to vector<30x16xf32>
    %30 = arith.mulf %29, %24 : vector<30x16xf32>
    %31 = vector.extract_strided_slice %5 {offsets = [0, 2], sizes = [30, 1], strides = [1, 1]} : vector<30x3xf32> to vector<30x1xf32>
    %32 = vector.broadcast %31 : vector<30x1xf32> to vector<30x16xf32>
    %33 = arith.mulf %32, %24 : vector<30x16xf32>
    %34 = tpu.concatenate %27, %30, %33 in 1 : vector<30x16xf32>, vector<30x16xf32>, vector<30x16xf32> -> vector<30x48xf32>
    %c1_15 = arith.constant 1 : index
    %c0_16 = arith.constant 0 : index
    %c0_17 = arith.constant 0 : index
    %35 = vector.load %arg2[%c1_15, %c0_16, %c0_17] : memref<9x384x128xf32, #tpu.memory_space<vmem>>, vector<1x48x32xf32>
    %36 = vector.shape_cast %35 : vector<1x48x32xf32> to vector<48x32xf32>
    %cst_18 = arith.constant dense<0.000000e+00> : vector<30x32xf32>
    %37 = tpu.matmul %34, %36, %cst_18 {dimension_numbers = #tpu.dot_dimension_numbers<[1], [0], [0], [1], [0, 0, 1, 1], [], []>} : vector<30x48xf32>, vector<48x32xf32>, vector<30x32xf32> -> vector<30x32xf32>
    %cst_19 = arith.constant dense<0.000000e+00> : vector<64x32xf32>
    %38 = tpu.matmul %3, %37, %cst_19 {dimension_numbers = #tpu.dot_dimension_numbers<[1], [0], [0], [1], [0, 0, 1, 1], [], []>} : vector<64x30xf32>, vector<30x32xf32>, vector<64x32xf32> -> vector<64x32xf32>
    %cst_20 = arith.constant 0.000000e+00 : f32
    %39 = vector.broadcast %cst_20 : f32 to vector<64x32xf32>
    %40 = arith.maximumf %38, %39 : vector<64x32xf32>
    %cst_21 = arith.constant dense<0.000000e+00> : vector<30x32xf32>
    %41 = tpu.matmul %1, %40, %cst_21 {dimension_numbers = #tpu.dot_dimension_numbers<[1], [0], [0], [1], [0, 0, 1, 1], [], []>} : vector<30x64xf32>, vector<64x32xf32>, vector<30x32xf32> -> vector<30x32xf32>
    %42 = vector.extract_strided_slice %5 {offsets = [0, 0], sizes = [30, 1], strides = [1, 1]} : vector<30x3xf32> to vector<30x1xf32>
    %43 = vector.broadcast %42 : vector<30x1xf32> to vector<30x32xf32>
    %44 = arith.mulf %43, %41 : vector<30x32xf32>
    %45 = vector.extract_strided_slice %5 {offsets = [0, 1], sizes = [30, 1], strides = [1, 1]} : vector<30x3xf32> to vector<30x1xf32>
    %46 = vector.broadcast %45 : vector<30x1xf32> to vector<30x32xf32>
    %47 = arith.mulf %46, %41 : vector<30x32xf32>
    %48 = vector.extract_strided_slice %5 {offsets = [0, 2], sizes = [30, 1], strides = [1, 1]} : vector<30x3xf32> to vector<30x1xf32>
    %49 = vector.broadcast %48 : vector<30x1xf32> to vector<30x32xf32>
    %50 = arith.mulf %49, %41 : vector<30x32xf32>
    %51 = tpu.concatenate %44, %47, %50 in 1 : vector<30x32xf32>, vector<30x32xf32>, vector<30x32xf32> -> vector<30x96xf32>
    %c2_22 = arith.constant 2 : index
    %c0_23 = arith.constant 0 : index
    %c0_24 = arith.constant 0 : index
    %52 = vector.load %arg2[%c2_22, %c0_23, %c0_24] : memref<9x384x128xf32, #tpu.memory_space<vmem>>, vector<1x96x64xf32>
    %53 = vector.shape_cast %52 : vector<1x96x64xf32> to vector<96x64xf32>
    %cst_25 = arith.constant dense<0.000000e+00> : vector<30x64xf32>
    %54 = tpu.matmul %51, %53, %cst_25 {dimension_numbers = #tpu.dot_dimension_numbers<[1], [0], [0], [1], [0, 0, 1, 1], [], []>} : vector<30x96xf32>, vector<96x64xf32>, vector<30x64xf32> -> vector<30x64xf32>
    %cst_26 = arith.constant dense<0.000000e+00> : vector<64x64xf32>
    %55 = tpu.matmul %3, %54, %cst_26 {dimension_numbers = #tpu.dot_dimension_numbers<[1], [0], [0], [1], [0, 0, 1, 1], [], []>} : vector<64x30xf32>, vector<30x64xf32>, vector<64x64xf32> -> vector<64x64xf32>
    %cst_27 = arith.constant 0.000000e+00 : f32
    %56 = vector.broadcast %cst_27 : f32 to vector<64x64xf32>
    %57 = arith.maximumf %55, %56 : vector<64x64xf32>
    %cst_28 = arith.constant dense<0.000000e+00> : vector<30x64xf32>
    %58 = tpu.matmul %1, %57, %cst_28 {dimension_numbers = #tpu.dot_dimension_numbers<[1], [0], [0], [1], [0, 0, 1, 1], [], []>} : vector<30x64xf32>, vector<64x64xf32>, vector<30x64xf32> -> vector<30x64xf32>
    %59 = vector.extract_strided_slice %5 {offsets = [0, 0], sizes = [30, 1], strides = [1, 1]} : vector<30x3xf32> to vector<30x1xf32>
    %60 = vector.broadcast %59 : vector<30x1xf32> to vector<30x64xf32>
    %61 = arith.mulf %60, %58 : vector<30x64xf32>
    %62 = vector.extract_strided_slice %5 {offsets = [0, 1], sizes = [30, 1], strides = [1, 1]} : vector<30x3xf32> to vector<30x1xf32>
    %63 = vector.broadcast %62 : vector<30x1xf32> to vector<30x64xf32>
    %64 = arith.mulf %63, %58 : vector<30x64xf32>
    %65 = vector.extract_strided_slice %5 {offsets = [0, 2], sizes = [30, 1], strides = [1, 1]} : vector<30x3xf32> to vector<30x1xf32>
    %66 = vector.broadcast %65 : vector<30x1xf32> to vector<30x64xf32>
    %67 = arith.mulf %66, %58 : vector<30x64xf32>
    %68 = tpu.concatenate %61, %64, %67 in 1 : vector<30x64xf32>, vector<30x64xf32>, vector<30x64xf32> -> vector<30x192xf32>
    %c3 = arith.constant 3 : index
    %c0_29 = arith.constant 0 : index
    %c0_30 = arith.constant 0 : index
    %69 = vector.load %arg2[%c3, %c0_29, %c0_30] : memref<9x384x128xf32, #tpu.memory_space<vmem>>, vector<1x192x128xf32>
    %70 = vector.shape_cast %69 : vector<1x192x128xf32> to vector<192x128xf32>
    %cst_31 = arith.constant dense<0.000000e+00> : vector<30x128xf32>
    %71 = tpu.matmul %68, %70, %cst_31 {dimension_numbers = #tpu.dot_dimension_numbers<[1], [0], [0], [1], [0, 0, 1, 1], [], []>} : vector<30x192xf32>, vector<192x128xf32>, vector<30x128xf32> -> vector<30x128xf32>
    %cst_32 = arith.constant dense<0.000000e+00> : vector<64x128xf32>
    %72 = tpu.matmul %3, %71, %cst_32 {dimension_numbers = #tpu.dot_dimension_numbers<[1], [0], [0], [1], [0, 0, 1, 1], [], []>} : vector<64x30xf32>, vector<30x128xf32>, vector<64x128xf32> -> vector<64x128xf32>
    %cst_33 = arith.constant 0.000000e+00 : f32
    %73 = vector.broadcast %cst_33 : f32 to vector<64x128xf32>
    %74 = arith.maximumf %72, %73 : vector<64x128xf32>
    %cst_34 = arith.constant dense<0.000000e+00> : vector<30x128xf32>
    %75 = tpu.matmul %1, %74, %cst_34 {dimension_numbers = #tpu.dot_dimension_numbers<[1], [0], [0], [1], [0, 0, 1, 1], [], []>} : vector<30x64xf32>, vector<64x128xf32>, vector<30x128xf32> -> vector<30x128xf32>
    %76 = vector.extract_strided_slice %5 {offsets = [0, 0], sizes = [30, 1], strides = [1, 1]} : vector<30x3xf32> to vector<30x1xf32>
    %77 = vector.broadcast %76 : vector<30x1xf32> to vector<30x128xf32>
    %78 = arith.mulf %77, %75 : vector<30x128xf32>
    %79 = vector.extract_strided_slice %5 {offsets = [0, 1], sizes = [30, 1], strides = [1, 1]} : vector<30x3xf32> to vector<30x1xf32>
    %80 = vector.broadcast %79 : vector<30x1xf32> to vector<30x128xf32>
    %81 = arith.mulf %80, %75 : vector<30x128xf32>
    %82 = vector.extract_strided_slice %5 {offsets = [0, 2], sizes = [30, 1], strides = [1, 1]} : vector<30x3xf32> to vector<30x1xf32>
    %83 = vector.broadcast %82 : vector<30x1xf32> to vector<30x128xf32>
    %84 = arith.mulf %83, %75 : vector<30x128xf32>
    %85 = tpu.concatenate %78, %81, %84 in 1 : vector<30x128xf32>, vector<30x128xf32>, vector<30x128xf32> -> vector<30x384xf32>
    %c4 = arith.constant 4 : index
    %c0_35 = arith.constant 0 : index
    %c0_36 = arith.constant 0 : index
    %86 = vector.load %arg2[%c4, %c0_35, %c0_36] : memref<9x384x128xf32, #tpu.memory_space<vmem>>, vector<1x384x64xf32>
    %87 = vector.shape_cast %86 : vector<1x384x64xf32> to vector<384x64xf32>
    %cst_37 = arith.constant dense<0.000000e+00> : vector<30x64xf32>
    %88 = tpu.matmul %85, %87, %cst_37 {dimension_numbers = #tpu.dot_dimension_numbers<[1], [0], [0], [1], [0, 0, 1, 1], [], []>} : vector<30x384xf32>, vector<384x64xf32>, vector<30x64xf32> -> vector<30x64xf32>
    %89 = tpu.concatenate %88, %58 in 1 : vector<30x64xf32>, vector<30x64xf32> -> vector<30x128xf32>
    %cst_38 = arith.constant dense<0.000000e+00> : vector<64x128xf32>
    %90 = tpu.matmul %3, %89, %cst_38 {dimension_numbers = #tpu.dot_dimension_numbers<[1], [0], [0], [1], [0, 0, 1, 1], [], []>} : vector<64x30xf32>, vector<30x128xf32>, vector<64x128xf32> -> vector<64x128xf32>
    %cst_39 = arith.constant 0.000000e+00 : f32
    %91 = vector.broadcast %cst_39 : f32 to vector<64x128xf32>
    %92 = arith.maximumf %90, %91 : vector<64x128xf32>
    %cst_40 = arith.constant dense<0.000000e+00> : vector<30x128xf32>
    %93 = tpu.matmul %1, %92, %cst_40 {dimension_numbers = #tpu.dot_dimension_numbers<[1], [0], [0], [1], [0, 0, 1, 1], [], []>} : vector<30x64xf32>, vector<64x128xf32>, vector<30x128xf32> -> vector<30x128xf32>
    %94 = vector.extract_strided_slice %5 {offsets = [0, 0], sizes = [30, 1], strides = [1, 1]} : vector<30x3xf32> to vector<30x1xf32>
    %95 = vector.broadcast %94 : vector<30x1xf32> to vector<30x128xf32>
    %96 = arith.mulf %95, %93 : vector<30x128xf32>
    %97 = vector.extract_strided_slice %5 {offsets = [0, 1], sizes = [30, 1], strides = [1, 1]} : vector<30x3xf32> to vector<30x1xf32>
    %98 = vector.broadcast %97 : vector<30x1xf32> to vector<30x128xf32>
    %99 = arith.mulf %98, %93 : vector<30x128xf32>
    %100 = vector.extract_strided_slice %5 {offsets = [0, 2], sizes = [30, 1], strides = [1, 1]} : vector<30x3xf32> to vector<30x1xf32>
    %101 = vector.broadcast %100 : vector<30x1xf32> to vector<30x128xf32>
    %102 = arith.mulf %101, %93 : vector<30x128xf32>
    %103 = tpu.concatenate %96, %99, %102 in 1 : vector<30x128xf32>, vector<30x128xf32>, vector<30x128xf32> -> vector<30x384xf32>
    %c5 = arith.constant 5 : index
    %c0_41 = arith.constant 0 : index
    %c0_42 = arith.constant 0 : index
    %104 = vector.load %arg2[%c5, %c0_41, %c0_42] : memref<9x384x128xf32, #tpu.memory_space<vmem>>, vector<1x384x32xf32>
    %105 = vector.shape_cast %104 : vector<1x384x32xf32> to vector<384x32xf32>
    %cst_43 = arith.constant dense<0.000000e+00> : vector<30x32xf32>
    %106 = tpu.matmul %103, %105, %cst_43 {dimension_numbers = #tpu.dot_dimension_numbers<[1], [0], [0], [1], [0, 0, 1, 1], [], []>} : vector<30x384xf32>, vector<384x32xf32>, vector<30x32xf32> -> vector<30x32xf32>
    %107 = tpu.concatenate %106, %41 in 1 : vector<30x32xf32>, vector<30x32xf32> -> vector<30x64xf32>
    %cst_44 = arith.constant dense<0.000000e+00> : vector<64x64xf32>
    %108 = tpu.matmul %3, %107, %cst_44 {dimension_numbers = #tpu.dot_dimension_numbers<[1], [0], [0], [1], [0, 0, 1, 1], [], []>} : vector<64x30xf32>, vector<30x64xf32>, vector<64x64xf32> -> vector<64x64xf32>
    %cst_45 = arith.constant 0.000000e+00 : f32
    %109 = vector.broadcast %cst_45 : f32 to vector<64x64xf32>
    %110 = arith.maximumf %108, %109 : vector<64x64xf32>
    %cst_46 = arith.constant dense<0.000000e+00> : vector<30x64xf32>
    %111 = tpu.matmul %1, %110, %cst_46 {dimension_numbers = #tpu.dot_dimension_numbers<[1], [0], [0], [1], [0, 0, 1, 1], [], []>} : vector<30x64xf32>, vector<64x64xf32>, vector<30x64xf32> -> vector<30x64xf32>
    %112 = vector.extract_strided_slice %5 {offsets = [0, 0], sizes = [30, 1], strides = [1, 1]} : vector<30x3xf32> to vector<30x1xf32>
    %113 = vector.broadcast %112 : vector<30x1xf32> to vector<30x64xf32>
    %114 = arith.mulf %113, %111 : vector<30x64xf32>
    %115 = vector.extract_strided_slice %5 {offsets = [0, 1], sizes = [30, 1], strides = [1, 1]} : vector<30x3xf32> to vector<30x1xf32>
    %116 = vector.broadcast %115 : vector<30x1xf32> to vector<30x64xf32>
    %117 = arith.mulf %116, %111 : vector<30x64xf32>
    %118 = vector.extract_strided_slice %5 {offsets = [0, 2], sizes = [30, 1], strides = [1, 1]} : vector<30x3xf32> to vector<30x1xf32>
    %119 = vector.broadcast %118 : vector<30x1xf32> to vector<30x64xf32>
    %120 = arith.mulf %119, %111 : vector<30x64xf32>
    %121 = tpu.concatenate %114, %117, %120 in 1 : vector<30x64xf32>, vector<30x64xf32>, vector<30x64xf32> -> vector<30x192xf32>
    %c6 = arith.constant 6 : index
    %c0_47 = arith.constant 0 : index
    %c0_48 = arith.constant 0 : index
    %122 = vector.load %arg2[%c6, %c0_47, %c0_48] : memref<9x384x128xf32, #tpu.memory_space<vmem>>, vector<1x192x16xf32>
    %123 = vector.shape_cast %122 : vector<1x192x16xf32> to vector<192x16xf32>
    %cst_49 = arith.constant dense<0.000000e+00> : vector<30x16xf32>
    %124 = tpu.matmul %121, %123, %cst_49 {dimension_numbers = #tpu.dot_dimension_numbers<[1], [0], [0], [1], [0, 0, 1, 1], [], []>} : vector<30x192xf32>, vector<192x16xf32>, vector<30x16xf32> -> vector<30x16xf32>
    %125 = tpu.concatenate %124, %24 in 1 : vector<30x16xf32>, vector<30x16xf32> -> vector<30x32xf32>
    %cst_50 = arith.constant dense<0.000000e+00> : vector<64x32xf32>
    %126 = tpu.matmul %3, %125, %cst_50 {dimension_numbers = #tpu.dot_dimension_numbers<[1], [0], [0], [1], [0, 0, 1, 1], [], []>} : vector<64x30xf32>, vector<30x32xf32>, vector<64x32xf32> -> vector<64x32xf32>
    %cst_51 = arith.constant 0.000000e+00 : f32
    %127 = vector.broadcast %cst_51 : f32 to vector<64x32xf32>
    %128 = arith.maximumf %126, %127 : vector<64x32xf32>
    %cst_52 = arith.constant dense<0.000000e+00> : vector<30x32xf32>
    %129 = tpu.matmul %1, %128, %cst_52 {dimension_numbers = #tpu.dot_dimension_numbers<[1], [0], [0], [1], [0, 0, 1, 1], [], []>} : vector<30x64xf32>, vector<64x32xf32>, vector<30x32xf32> -> vector<30x32xf32>
    %130 = vector.extract_strided_slice %5 {offsets = [0, 0], sizes = [30, 1], strides = [1, 1]} : vector<30x3xf32> to vector<30x1xf32>
    %131 = vector.broadcast %130 : vector<30x1xf32> to vector<30x32xf32>
    %132 = arith.mulf %131, %129 : vector<30x32xf32>
    %133 = vector.extract_strided_slice %5 {offsets = [0, 1], sizes = [30, 1], strides = [1, 1]} : vector<30x3xf32> to vector<30x1xf32>
    %134 = vector.broadcast %133 : vector<30x1xf32> to vector<30x32xf32>
    %135 = arith.mulf %134, %129 : vector<30x32xf32>
    %136 = vector.extract_strided_slice %5 {offsets = [0, 2], sizes = [30, 1], strides = [1, 1]} : vector<30x3xf32> to vector<30x1xf32>
    %137 = vector.broadcast %136 : vector<30x1xf32> to vector<30x32xf32>
    %138 = arith.mulf %137, %129 : vector<30x32xf32>
    %139 = tpu.concatenate %132, %135, %138 in 1 : vector<30x32xf32>, vector<30x32xf32>, vector<30x32xf32> -> vector<30x96xf32>
    %c7 = arith.constant 7 : index
    %c0_53 = arith.constant 0 : index
    %c0_54 = arith.constant 0 : index
    %140 = vector.load %arg2[%c7, %c0_53, %c0_54] : memref<9x384x128xf32, #tpu.memory_space<vmem>>, vector<1x96x16xf32>
    %141 = vector.shape_cast %140 : vector<1x96x16xf32> to vector<96x16xf32>
    %cst_55 = arith.constant dense<0.000000e+00> : vector<30x16xf32>
    %142 = tpu.matmul %139, %141, %cst_55 {dimension_numbers = #tpu.dot_dimension_numbers<[1], [0], [0], [1], [0, 0, 1, 1], [], []>} : vector<30x96xf32>, vector<96x16xf32>, vector<30x16xf32> -> vector<30x16xf32>
    %cst_56 = arith.constant dense<0.000000e+00> : vector<64x16xf32>
    %143 = tpu.matmul %3, %142, %cst_56 {dimension_numbers = #tpu.dot_dimension_numbers<[1], [0], [0], [1], [0, 0, 1, 1], [], []>} : vector<64x30xf32>, vector<30x16xf32>, vector<64x16xf32> -> vector<64x16xf32>
    %cst_57 = arith.constant 0.000000e+00 : f32
    %144 = vector.broadcast %cst_57 : f32 to vector<64x16xf32>
    %145 = arith.maximumf %143, %144 : vector<64x16xf32>
    %cst_58 = arith.constant dense<0.000000e+00> : vector<30x16xf32>
    %146 = tpu.matmul %1, %145, %cst_58 {dimension_numbers = #tpu.dot_dimension_numbers<[1], [0], [0], [1], [0, 0, 1, 1], [], []>} : vector<30x64xf32>, vector<64x16xf32>, vector<30x16xf32> -> vector<30x16xf32>
    %147 = vector.extract_strided_slice %5 {offsets = [0, 0], sizes = [30, 1], strides = [1, 1]} : vector<30x3xf32> to vector<30x1xf32>
    %148 = vector.broadcast %147 : vector<30x1xf32> to vector<30x16xf32>
    %149 = arith.mulf %148, %146 : vector<30x16xf32>
    %150 = vector.extract_strided_slice %5 {offsets = [0, 1], sizes = [30, 1], strides = [1, 1]} : vector<30x3xf32> to vector<30x1xf32>
    %151 = vector.broadcast %150 : vector<30x1xf32> to vector<30x16xf32>
    %152 = arith.mulf %151, %146 : vector<30x16xf32>
    %153 = vector.extract_strided_slice %5 {offsets = [0, 2], sizes = [30, 1], strides = [1, 1]} : vector<30x3xf32> to vector<30x1xf32>
    %154 = vector.broadcast %153 : vector<30x1xf32> to vector<30x16xf32>
    %155 = arith.mulf %154, %146 : vector<30x16xf32>
    %156 = tpu.concatenate %149, %152, %155 in 1 : vector<30x16xf32>, vector<30x16xf32>, vector<30x16xf32> -> vector<30x48xf32>
    %c8 = arith.constant 8 : index
    %c0_59 = arith.constant 0 : index
    %c0_60 = arith.constant 0 : index
    %157 = vector.load %arg2[%c8, %c0_59, %c0_60] : memref<9x384x128xf32, #tpu.memory_space<vmem>>, vector<1x48x8xf32>
    %158 = vector.shape_cast %157 : vector<1x48x8xf32> to vector<48x8xf32>
    %cst_61 = arith.constant dense<0.000000e+00> : vector<30x8xf32>
    %159 = tpu.matmul %156, %158, %cst_61 {dimension_numbers = #tpu.dot_dimension_numbers<[1], [0], [0], [1], [0, 0, 1, 1], [], []>} : vector<30x48xf32>, vector<48x8xf32>, vector<30x8xf32> -> vector<30x8xf32>
    %c0_62 = arith.constant 0 : index
    %c0_63 = arith.constant 0 : index
    %c0_64 = arith.constant 0 : index
    %160 = vector.load %arg4[%c0_62, %c0_63, %c0_64] : memref<1x30x8xf32, #tpu.memory_space<vmem>>, vector<1x30x8xf32>
    %161 = vector.shape_cast %160 : vector<1x30x8xf32> to vector<30x8xf32>
    %162 = vector.shape_cast %159 : vector<30x8xf32> to vector<1x30x8xf32>
    tpu.vector_store %arg4[%c0_62, %c0_63, %c0_64], %162 {strides = array<i32>} : memref<1x30x8xf32, #tpu.memory_space<vmem>>, vector<1x30x8xf32>,
    return
  }
  func.func @transform_0(%arg0: i32) -> (i32, i32, i32) {
    %c0_i32 = arith.constant 0 : i32
    %c0_i32_0 = arith.constant 0 : i32
    %c0_i32_1 = arith.constant 0 : i32
    return %arg0, %c0_i32, %c0_i32_0 : i32, i32, i32
  }
  func.func @transform_1(%arg0: i32) -> (i32, i32, i32) {
    %c0_i32 = arith.constant 0 : i32
    %c0_i32_0 = arith.constant 0 : i32
    %c0_i32_1 = arith.constant 0 : i32
    %c0_i32_2 = arith.constant 0 : i32
    return %c0_i32, %c0_i32_0, %c0_i32_1 : i32, i32, i32
  }
  func.func @transform_2(%arg0: i32) -> (i32, i32, i32) {
    %c0_i32 = arith.constant 0 : i32
    %c0_i32_0 = arith.constant 0 : i32
    %c0_i32_1 = arith.constant 0 : i32
    %c0_i32_2 = arith.constant 0 : i32
    return %c0_i32, %c0_i32_0, %c0_i32_1 : i32, i32, i32
  }
  func.func @transform_3(%arg0: i32) -> (i32, i32, i32) {
    %c0_i32 = arith.constant 0 : i32
    %c0_i32_0 = arith.constant 0 : i32
    %c0_i32_1 = arith.constant 0 : i32
    return %arg0, %c0_i32, %c0_i32_0 : i32, i32, i32
  }
}

</mosaic_0001>

<bundles_post_ra>
// kernel: tile.6
= control target key start
LH: loop header
LB: loop body
LE: loop exit
PB: predicated region body
PF: predicated region fallthrough
CT: control target
= control target key end

     0   :  { %s22_s0 = inlined_call_operand.vmem [shape: s32[15], index: 0, kind: input, shape index: {}]   ;;  %s23_s1 = inlined_call_operand.vmem [shape: s32[2,15], index: 1, kind: output, shape index: {}]  }
   0x1   :  { %v4_v0 = vld [vmem:[%s22_s0] ss:$0 sm:$0xff] }
   0x2   :  { %5 = vst [vmem:[%s23_s1] sm:$0x3] %v4_v0 }

// kernel: unet_forward.1
= control target key start
LH: loop header
LB: loop body
LE: loop exit
PB: predicated region body
PF: predicated region fallthrough
CT: control target
= control target key end

     0   :  { %v4630_v0 = vmov 2   ;;  %v4631_v1 = vmov 1   ;;  %v4632_v6 = vmov 0   ;;  %vm157_vm0 = vcmask 1043456   ;;  %s4633_s28 = smov 4   ;;  %s4634_s4 = smov 8   ;;  %s5956_s2 = inlined_call_operand.vmem [shape: f32[3,64,64], index: 2, kind: input, shape index: {}]   ;;  %s5957_s1 = inlined_call_operand.vmem [shape: f32[9,384,128], index: 1, kind: input, shape index: {}]   ;;  %s5958_s0 = inlined_call_operand.vmem [shape: f32[1,30,4], index: 0, kind: input, shape index: {}]   ;;  %s5959_s3 = inlined_call_operand.vmem [shape: f32[1,30,8], index: 3, kind: output, shape index: {}]  }
   0x1   :  { %4603 = vset.pattern.permute.xlu1 %v4630_v0  ;;  %4602 = vset.pattern.permute.xlu0 %v4631_v1  ;;  %v3380_v2 = vld [vmem:[%s5956_s2 + $0x80] sm:$0xff]  ;;  %v3381_v3 = vld [vmem:[%s5956_s2 + $0x88] sm:$0xff]  ;;  %v3382_v4 = vld [vmem:[%s5956_s2 + $0x90] sm:$0xff]  ;;  %vm132_vm1 = vcmask 31744   ;;  %vm137_vm2 = vcmask 64512   ;;  %vm144_vm3 = vcmask 97280  }
   0x2   :  { %81 = vperm.xlu1 %4603, %v3380_v2   ;;  %61 = vperm.xlu0 %4602, %v3380_v2   ;;  %v3383_v5 = vld [vmem:[%s5956_s2 + $0x98] sm:$0x3f]  ;;  %v143_v7 = vld [vmem:[%s5957_s1 + $0x8] sm:$0xf]  ;;  %v142_v8 = vld [vmem:[%s5957_s1] sm:$0xff]  ;;  %vm246_vm4 = vcmask 244736  }
   0x3   :  { %4075 = vmatprep.subr.msk.mxu0 %vm157_vm0, %v143_v7  ;;  %v32_v9 = vld [vmem:[%s5958_s0] sm:$0xff]  ;;  %v33_v13 = vld [vmem:[%s5958_s0 + $0x8] sm:$0xff]  ;;  %v34_v18 = vld [vmem:[%s5958_s0 + $0x10] sm:$0xff]  ;;  %vm271_vm5 = vcmask 1045504   ;;  %vm388_vm6 = vcmask 523264   ;;  %s4635_s14 = smov 16  }
   0x4   :  { %4076 = vmatpush3.msk.msra.mxu0 %vm157_vm0, %v143_v7  ;;  %v35_v20 = vld [vmem:[%s5958_s0 + $0x18] sm:$0x3f]  ;;  %v4740_v53 = vld [vmem:[%s5956_s2 + $0x40] sm:$0xff]  ;;  %v4749_v58 = vld [vmem:[%s5956_s2 + $0x48] sm:$0xff]  ;;  %s4636_s15 = smov 32   ;;  %vm530_vm7 = vcmask 130048  }
   0x5   :  { %4077 = vmatprep.subr.mxu0 %v142_v8  ;;  %4093 = vmatprep.mubr.msk.f32.mxu1 %vm246_vm4, %v4740_v53  ;;  %v4754_v59 = vld [vmem:[%s5956_s2 + $0x50] sm:$0xff]  ;;  %v4763_v60 = vld [vmem:[%s5956_s2 + $0x58] sm:$0xff]  ;;  %v4768_v61 = vld [vmem:[%s5956_s2 + $0x60] sm:$0xff]  ;;  %vm535_vm8 = vcmask 261120   ;;  %vm547_vm9 = vcmask 392192   ;;  %s4637_s12 = smov 64  }
   0x6   :  { %85 = vperm.xlu1 %4603, %v3381_v3   ;;  %65 = vperm.xlu0 %4602, %v3381_v3   ;;  %v4777_v62 = vld [vmem:[%s5956_s2 + $0x68] sm:$0xff]  ;;  %v4782_v63 = vld [vmem:[%s5956_s2 + $0x70] sm:$0xff]  ;;  %vm911_vm10 = vcmask 785408   ;;  %vm3366_vm11 = vcmask 62464  }
   0x7   :  { %4078 = vmatpush3.msra.mxu0 %v142_v8 }
   0xa   :  { %69 = vperm.xlu0 %4602, %v3382_v4   ;;  %4604 = vset.pattern.permute.xlu1 %v4631_v1  ;;  %v4798_v1 = vld [vmem:[%s5956_s2] sm:$0xff] }
   0xb   :  { %73 = vperm.xlu1 %4604, %v3383_v5  }
   0xe   :  { %4605 = vset.pattern.permute.xlu0 %v4630_v0 }
   0xf   :  { %89 = vperm.xlu0 %4605, %v3382_v4   ;;  %4606 = vset.pattern.permute.xlu1 %v4630_v0 }
  0x10   :  { %93 = vperm.xlu1 %4606, %v3383_v5  }
  0x13   :  { %4608 = vset.pattern.permute.xlu0 %v4632_v6 }
  0x14   :  { %4607 = vset.pattern.permute.xlu1 %v4632_v6  ;;  %43 = vperm.xlu0 %4608, %v3381_v3  }
  0x15   :  { %38 = vperm.xlu1 %4607, %v3380_v2  }
  0x18   :  { %4609 = vset.pattern.permute.xlu0 %v4630_v0  ;;  %v4791_v0 = vld [vmem:[%s5956_s2 + $0x78] sm:$0xff] }
  0x19   :  { %48 = vperm.xlu1 %4607, %v3382_v4  }
  0x1d   :  { %53 = vperm.xlu1 %4607, %v3383_v5  }
  0x7d   :  { %v4680_v10 = vpop.permute.xlu1 %81  ;;  %v4682_v11 = vpop.permute.xlu0 %61 }
  0x7e   :  { %v76_v12 = vmul.f32 %v4682_v11, %v32_v9  ;;  %v96_v17 = vmul.f32 %v4680_v10, %v32_v9 }
  0x80   :  { %104 = vrot.lane.b32.xlu0 %v76_v12, %s4633_s28 }
  0x81   :  { %v4688_v14 = vpop.permute.xlu0 %65  ;;  %v4690_v15 = vpop.permute.xlu1 %85 }
  0x82   :  { %v77_v16 = vmul.f32 %v4688_v14, %v33_v13  ;;  %v97_v22 = vmul.f32 %v4690_v15, %v33_v13 }
  0x84   :  { %106 = vrot.lane.b32.xlu1 %v77_v16, %s4633_s28  ;;  %120 = vrot.lane.b32.xlu0 %v96_v17, %s4634_s4 }
  0x85   :  { %v4697_v19 = vpop.permute.xlu0 %69 }
  0x86   :  { %v4702_v21 = vpop.permute.xlu1 %73  ;;  %v78_v23 = vmul.f32 %v4697_v19, %v34_v18 }
  0x87   :  { %v79_v24 = vmul.f32 %v4702_v21, %v35_v20 }
  0x88   :  { %122 = vrot.lane.b32.xlu1 %v97_v22, %s4634_s4  ;;  %108 = vrot.lane.b32.xlu0 %v78_v23, %s4633_s28 }
  0x8a   :  { %v4707_v25 = vpop.permute.xlu0 %89 }
  0x8b   :  { %v4709_v26 = vpop.permute.xlu1 %93  ;;  %v98_v27 = vmul.f32 %v4707_v25, %v34_v18 }
  0x8c   :  { %110 = vrot.lane.b32.xlu1 %v79_v24, %s4633_s28  ;;  %v99_v28 = vmul.f32 %v4709_v26, %v35_v20  ;;  %v4805_v24 = vld [vmem:[%s5956_s2 + $0x8] sm:$0xff] }
  0x8d   :  { %124 = vrot.lane.b32.xlu0 %v98_v27, %s4634_s4  ;;  %v4810_v27 = vld [vmem:[%s5956_s2 + $0x10] sm:$0xff] }
  0x8f   :  { %v4717_v31 = vpop.permute.xlu0 %43 }
  0x90   :  { %126 = vrot.lane.b32.xlu1 %v99_v28, %s4634_s4  ;;  %v4713_v29 = vpop.permute.xlu1 %38  ;;  %v57_v39 = vmul.f32 %v4717_v31, %v33_v13  ;;  %v4819_v28 = vld [vmem:[%s5956_s2 + $0x18] sm:$0x3f] }
  0x91   :  { %v56_v34 = vmul.f32 %v4713_v29, %v32_v9 }
  0x94   :  { %v4715_v30 = vpop.permute.xlu1 %48 }
  0x95   :  { %v58_v44 = vmul.f32 %v4715_v30, %v34_v18 }
  0x98   :  { %v4719_v32 = vpop.permute.xlu1 %53 }
  0x99   :  { %v59_v48 = vmul.f32 %v4719_v32, %v35_v20 }
  0xf2   :  { %v105_v33 = vpop.permute.xlu0 %104 }
  0xf3   :  { %v133_v35 = vsel %vm132_vm1, %v56_v34, %v105_v33  ;;  %v3407_v33 = vld [vmem:[%s5957_s1 + $0x1a8] sm:$0xff]  ;;  %v3406_v34 = vld [vmem:[%s5957_s1 + $0x1a0] sm:$0xff] }
  0xf6   :  { %v107_v36 = vpop.permute.xlu1 %106  ;;  %v121_v37 = vpop.permute.xlu0 %120 }
  0xf7   :  { %v138_v38 = vsel %vm137_vm2, %v133_v35, %v121_v37  ;;  %v134_v40 = vsel %vm132_vm1, %v57_v39, %v107_v36  ;;  %v3405_v35 = vld [vmem:[%s5957_s1 + $0x198] sm:$0xff]  ;;  %v3404_v36 = vld [vmem:[%s5957_s1 + $0x190] sm:$0xff]  ;;  %v3403_v37 = vld [vmem:[%s5957_s1 + $0x188] sm:$0xff] }
  0xf8   :  { %4079 = vmatprep.mubr.msk.f32.mxu0 %vm144_vm3, %v138_v38  ;;  %v3402_v38 = vld [vmem:[%s5957_s1 + $0x180] sm:$0xff] }
  0xfa   :  { %v123_v41 = vpop.permute.xlu1 %122  ;;  %v109_v42 = vpop.permute.xlu0 %108 }
  0xfb   :  { %v139_v43 = vsel %vm137_vm2, %v134_v40, %v123_v41  ;;  %v135_v46 = vsel %vm132_vm1, %v58_v44, %v109_v42 }
  0xfc   :  { %4080 = vmatmul.mubr.msk.f32.vlgmr.msra.gmra.mxu0 %vm144_vm3, %v139_v43 }
  0xfe   :  { %v111_v45 = vpop.permute.xlu1 %110 }
  0xff   :  { %v125_v47 = vpop.permute.xlu0 %124  ;;  %v136_v50 = vsel %vm132_vm1, %v59_v48, %v111_v45 }
 0x100   :  { %v140_v49 = vsel %vm137_vm2, %v135_v46, %v125_v47 }
 0x101   :  { %4082 = vmatprep.mubr.msk.f32.mxu0 %vm144_vm3, %v140_v49 }
 0x102   :  { %v127_v51 = vpop.permute.xlu1 %126 }
 0x103   :  { %v141_v52 = vsel %vm137_vm2, %v136_v50, %v127_v51 }
 0x104   :  { %4083 = vmatmul.mubr.msk.f32.gmra.mxu0 %vm144_vm3, %v141_v52 }
 0x105   :  { %4121 = vmatprep.mubr.msk.f32.mxu0 %vm388_vm6, %v4798_v1 }
 0x1bc   :  { %v4081_v54 = vpop.f32.mrf.mxu0 }
 0x1be   :  { %v227_v55 = vpop.f32.mrf.mxu0 }
 0x1c4   :  { %v4084_v56 = vpop.f32.mrf.mxu0 }
 0x1c5   :  { %4085 = vmatprep.subr.msk.mxu1 %vm271_vm5, %v4084_v56 }
 0x1c6   :  { %v237_v57 = vpop.f32.mrf.mxu0  ;;  %4086 = vmatpush3.msk.msra.mxu1 %vm271_vm5, %v4084_v56 }
 0x1c7   :  { %4087 = vmatprep.subr.mxu1 %v237_v57 }
 0x1c8   :  { %4088 = vmatpush3.msra.mxu1 %v237_v57 }
 0x1c9   :  { %4089 = vmatprep.subr.mxu1 %v4081_v54 }
 0x1ca   :  { %4090 = vmatpush3.msra.mxu1 %v4081_v54 }
 0x1cb   :  { %4091 = vmatprep.subr.mxu1 %v227_v55 }
 0x1cc   :  { %4092 = vmatpush3.msra.mxu1 %v227_v55 }
 0x1cd   :  { %4094 = vmatmul.mubr.msk.f32.vlgmr.msra.gmra.mxu1 %vm246_vm4, %v4749_v58  ;;  %4127 = vmatprep.subr.mxu1 %v3407_v33 }
 0x1ce   :  { %4096 = vmatprep.mubr.msk.f32.mxu1 %vm246_vm4, %v4754_v59  ;;  %4128 = vmatpush3.msra.mxu1 %v3407_v33 }
 0x1cf   :  { %4129 = vmatprep.subr.mxu1 %v3406_v34 }
 0x1d0   :  { %4130 = vmatpush3.msra.mxu1 %v3406_v34 }
 0x1d1   :  { %4097 = vmatmul.mubr.msk.f32.gmra.mxu1 %vm246_vm4, %v4763_v60  ;;  %4131 = vmatprep.subr.mxu1 %v3405_v35 }
 0x1d2   :  { %4099 = vmatprep.mubr.msk.f32.mxu1 %vm246_vm4, %v4768_v61  ;;  %4132 = vmatpush3.msra.mxu1 %v3405_v35 }
 0x1d3   :  { %4133 = vmatprep.subr.mxu1 %v3404_v36 }
 0x1d4   :  { %4134 = vmatpush3.msra.mxu1 %v3404_v36 }
 0x1d5   :  { %4100 = vmatmul.mubr.msk.f32.gmra.mxu1 %vm246_vm4, %v4777_v62  ;;  %4135 = vmatprep.subr.mxu1 %v3403_v37 }
 0x1d6   :  { %4102 = vmatprep.mubr.msk.f32.mxu1 %vm246_vm4, %v4782_v63  ;;  %4136 = vmatpush3.msra.mxu1 %v3403_v37 }
 0x1d7   :  { %4137 = vmatprep.subr.mxu1 %v3402_v38 }
 0x1d8   :  { %4138 = vmatpush3.msra.mxu1 %v3402_v38 }
 0x1d9   :  { %4103 = vmatmul.mubr.msk.f32.gmra.mxu1 %vm246_vm4, %v4791_v0 }
 0x28d   :  { %v4095_v2 = vpop.f32.mrf.mxu1 }
 0x28e   :  { %v381_v22 = vmax.f32 %v4095_v2, 0.0 }
 0x28f   :  { %v341_v3 = vpop.f32.mrf.mxu1 }
 0x290   :  { %v380_v23 = vmax.f32 %v341_v3, 0.0 }
 0x291   :  { %v4098_v4 = vpop.f32.mrf.mxu1 }
 0x292   :  { %v383_v18 = vmax.f32 %v4098_v4, 0.0 }
 0x293   :  { %v351_v5 = vpop.f32.mrf.mxu1 }
 0x294   :  { %v382_v20 = vmax.f32 %v351_v5, 0.0 }
 0x295   :  { %v4101_v6 = vpop.f32.mrf.mxu1 }
 0x296   :  { %v385_v16 = vmax.f32 %v4101_v6, 0.0 }
 0x297   :  { %v361_v7 = vpop.f32.mrf.mxu1 }
 0x298   :  { %v384_v17 = vmax.f32 %v361_v7, 0.0 }
 0x299   :  { %v4104_v8 = vpop.f32.mrf.mxu1 }
 0x29a   :  { %v387_v9 = vmax.f32 %v4104_v8, 0.0 }
 0x29b   :  { %v371_v12 = vpop.f32.mrf.mxu1 }
 0x29c   :  { %v386_v13 = vmax.f32 %v371_v12, 0.0  ;;  %4105 = vmatprep.subr.mxu0 %v387_v9 }
 0x29d   :  { %4106 = vmatpush3.msra.mxu0 %v387_v9 }
 0x29e   :  { %4107 = vmatprep.subr.mxu0 %v386_v13 }
 0x29f   :  { %4108 = vmatpush3.msra.mxu0 %v386_v13 }
 0x2a0   :  { %4109 = vmatprep.subr.mxu0 %v385_v16 }
 0x2a1   :  { %4110 = vmatpush3.msra.mxu0 %v385_v16 }
 0x2a2   :  { %4111 = vmatprep.subr.mxu0 %v384_v17 }
 0x2a3   :  { %4112 = vmatpush3.msra.mxu0 %v384_v17 }
 0x2a4   :  { %4113 = vmatprep.subr.mxu0 %v383_v18 }
 0x2a5   :  { %4114 = vmatpush3.msra.mxu0 %v383_v18 }
 0x2a6   :  { %4115 = vmatprep.subr.mxu0 %v382_v20 }
 0x2a7   :  { %4116 = vmatpush3.msra.mxu0 %v382_v20 }
 0x2a8   :  { %4117 = vmatprep.subr.mxu0 %v381_v22 }
 0x2a9   :  { %4118 = vmatpush3.msra.mxu0 %v381_v22 }
 0x2aa   :  { %4119 = vmatprep.subr.mxu0 %v380_v23 }
 0x2ab   :  { %4120 = vmatpush3.msra.mxu0 %v380_v23 }
 0x2ac   :  { %4122 = vmatmul.mubr.msk.f32.vlgmr.msra.gmra.mxu0 %vm388_vm6, %v4805_v24 }
 0x2ad   :  { %4124 = vmatprep.mubr.msk.f32.mxu0 %vm388_vm6, %v4810_v27 }
 0x2b0   :  { %4125 = vmatmul.mubr.msk.f32.gmra.mxu0 %vm388_vm6, %v4819_v28 }
 0x2b1   :  { %4153 = vmatprep.mubr.msk.f32.mxu0 %vm246_vm4, %v4740_v53 }
 0x36c   :  { %v4843_v39 = vpop.f32.mrf.mxu0 }
 0x36d   :  { %v491_v40 = vmul.f32 %v4843_v39, %v4688_v14  ;;  %v495_v44 = vmul.f32 %v4843_v39, %v4690_v15  ;;  %v487_v56 = vmul.f32 %v4843_v39, %v4717_v31 }
 0x36e   :  { %v4847_v41 = vpop.f32.mrf.mxu0 }
 0x36f   :  { %504 = vrot.lane.b32.xlu1 %v491_v40, %s4635_s14  ;;  %v490_v42 = vmul.f32 %v4847_v41, %v4682_v11  ;;  %v494_v45 = vmul.f32 %v4847_v41, %v4680_v10  ;;  %v486_v54 = vmul.f32 %v4847_v41, %v4713_v29 }
 0x370   :  { %v4852_v43 = vpop.f32.mrf.mxu0 }
 0x371   :  { %502 = vrot.lane.b32.xlu0 %v490_v42, %s4635_s14  ;;  %v493_v47 = vmul.f32 %v4852_v43, %v4702_v21  ;;  %v497_v49 = vmul.f32 %v4852_v43, %v4709_v26  ;;  %v489_v9 = vmul.f32 %v4852_v43, %v4719_v32 }
 0x372   :  { %v4860_v46 = vpop.f32.mrf.mxu0 }
 0x373   :  { %520 = vrot.lane.b32.xlu1 %v495_v44, %s4636_s15  ;;  %v492_v48 = vmul.f32 %v4860_v46, %v4697_v19  ;;  %v496_v50 = vmul.f32 %v4860_v46, %v4707_v25  ;;  %v488_v8 = vmul.f32 %v4860_v46, %v4715_v30 }
 0x375   :  { %518 = vrot.lane.b32.xlu0 %v494_v45, %s4636_s15 }
 0x377   :  { %508 = vrot.lane.b32.xlu1 %v493_v47, %s4635_s14 }
 0x379   :  { %506 = vrot.lane.b32.xlu0 %v492_v48, %s4635_s14 }
 0x37b   :  { %524 = vrot.lane.b32.xlu1 %v497_v49, %s4636_s15 }
 0x37d   :  { %522 = vrot.lane.b32.xlu0 %v496_v50, %s4636_s15 }
 0x3e1   :  { %v505_v51 = vpop.permute.xlu1 %504 }
 0x3e2   :  { %v532_v3 = vsel %vm530_vm7, %v487_v56, %v505_v51  ;;  %v3436_v56 = vld [vmem:[%s5957_s1 + $0x358] sm:$0xff] }
 0x3e3   :  { %v503_v52 = vpop.permute.xlu0 %502 }
 0x3e4   :  { %v531_v57 = vsel %vm530_vm7, %v486_v54, %v503_v52 }
 0x3e5   :  { %v521_v55 = vpop.permute.xlu1 %520 }
 0x3e6   :  { %v537_v5 = vsel %vm535_vm8, %v532_v3, %v521_v55  ;;  %v3433_v3 = vld [vmem:[%s5957_s1 + $0x340] sm:$0xff] }
 0x3e7   :  { %v519_v2 = vpop.permute.xlu0 %518 }
 0x3e8   :  { %v536_v4 = vsel %vm535_vm8, %v531_v57, %v519_v2  ;;  %v3435_v57 = vld [vmem:[%s5957_s1 + $0x350] sm:$0xff]  ;;  %v3434_v2 = vld [vmem:[%s5957_s1 + $0x348] sm:$0xff] }
 0x3e9   :  { %4139 = vmatprep.mubr.msk.f32.mxu1 %vm547_vm9, %v536_v4  ;;  %v509_v6 = vpop.permute.xlu1 %508  ;;  %v3432_v4 = vld [vmem:[%s5957_s1 + $0x338] sm:$0xff] }
 0x3ea   :  { %4140 = vmatmul.mubr.msk.f32.vlgmr.msra.gmra.mxu1 %vm547_vm9, %v537_v5  ;;  %v534_v17 = vsel %vm530_vm7, %v489_v9, %v509_v6  ;;  %v3431_v5 = vld [vmem:[%s5957_s1 + $0x330] sm:$0xff]  ;;  %v3430_v6 = vld [vmem:[%s5957_s1 + $0x328] sm:$0xff] }
 0x3eb   :  { %v507_v7 = vpop.permute.xlu0 %506  ;;  %v3427_v9 = vld [vmem:[%s5957_s1 + $0x310] sm:$0xff] }
 0x3ec   :  { %v533_v13 = vsel %vm530_vm7, %v488_v8, %v507_v7  ;;  %v3429_v7 = vld [vmem:[%s5957_s1 + $0x320] sm:$0xff]  ;;  %v3428_v8 = vld [vmem:[%s5957_s1 + $0x318] sm:$0xff] }
 0x3ed   :  { %v525_v12 = vpop.permute.xlu1 %524 }
 0x3ee   :  { %v539_v20 = vsel %vm535_vm8, %v534_v17, %v525_v12  ;;  %v3426_v12 = vld [vmem:[%s5957_s1 + $0x308] sm:$0xff] }
 0x3ef   :  { %v523_v16 = vpop.permute.xlu0 %522 }
 0x3f0   :  { %v538_v18 = vsel %vm535_vm8, %v533_v13, %v523_v16  ;;  %v3425_v13 = vld [vmem:[%s5957_s1 + $0x300] sm:$0xff] }
 0x3f1   :  { %4142 = vmatprep.mubr.msk.f32.mxu1 %vm547_vm9, %v538_v18 }
 0x3f2   :  { %4143 = vmatmul.mubr.msk.f32.gmra.mxu1 %vm547_vm9, %v539_v20 }
 0x3f3   :  { %4181 = vmatprep.mubr.msk.f32.mxu1 %vm388_vm6, %v4798_v1 }
 0x4aa   :  { %v4141_v22 = vpop.f32.mrf.mxu1 }
 0x4ac   :  { %v626_v23 = vpop.f32.mrf.mxu1 }
 0x4b2   :  { %v4144_v33 = vpop.f32.mrf.mxu1 }
 0x4b3   :  { %4145 = vmatprep.subr.msk.mxu0 %vm271_vm5, %v4144_v33 }
 0x4b4   :  { %v636_v34 = vpop.f32.mrf.mxu1  ;;  %4146 = vmatpush3.msk.msra.mxu0 %vm271_vm5, %v4144_v33 }
 0x4b5   :  { %4147 = vmatprep.subr.mxu0 %v636_v34 }
 0x4b6   :  { %4148 = vmatpush3.msra.mxu0 %v636_v34 }
 0x4b7   :  { %4149 = vmatprep.subr.mxu0 %v4141_v22 }
 0x4b8   :  { %4150 = vmatpush3.msra.mxu0 %v4141_v22 }
 0x4b9   :  { %4151 = vmatprep.subr.mxu0 %v626_v23 }
 0x4ba   :  { %4152 = vmatpush3.msra.mxu0 %v626_v23 }
 0x4bb   :  { %4154 = vmatmul.mubr.msk.f32.vlgmr.msra.gmra.mxu0 %vm246_vm4, %v4749_v58  ;;  %4187 = vmatprep.subr.mxu0 %v3436_v56 }
 0x4bc   :  { %4156 = vmatprep.mubr.msk.f32.mxu0 %vm246_vm4, %v4754_v59  ;;  %4188 = vmatpush3.msra.mxu0 %v3436_v56 }
 0x4bd   :  { %4189 = vmatprep.subr.mxu0 %v3435_v57 }
 0x4be   :  { %4190 = vmatpush3.msra.mxu0 %v3435_v57 }
 0x4bf   :  { %4157 = vmatmul.mubr.msk.f32.gmra.mxu0 %vm246_vm4, %v4763_v60  ;;  %4191 = vmatprep.subr.mxu0 %v3434_v2 }
 0x4c0   :  { %4159 = vmatprep.mubr.msk.f32.mxu0 %vm246_vm4, %v4768_v61  ;;  %4192 = vmatpush3.msra.mxu0 %v3434_v2 }
 0x4c1   :  { %4193 = vmatprep.subr.mxu0 %v3433_v3 }
 0x4c2   :  { %4194 = vmatpush3.msra.mxu0 %v3433_v3 }
 0x4c3   :  { %4160 = vmatmul.mubr.msk.f32.gmra.mxu0 %vm246_vm4, %v4777_v62  ;;  %4195 = vmatprep.subr.mxu0 %v3432_v4 }
 0x4c4   :  { %4162 = vmatprep.mubr.msk.f32.mxu0 %vm246_vm4, %v4782_v63  ;;  %4196 = vmatpush3.msra.mxu0 %v3432_v4 }
 0x4c5   :  { %4197 = vmatprep.subr.mxu0 %v3431_v5 }
 0x4c6   :  { %4198 = vmatpush3.msra.mxu0 %v3431_v5 }
 0x4c7   :  { %4163 = vmatmul.mubr.msk.f32.gmra.mxu0 %vm246_vm4, %v4791_v0  ;;  %4199 = vmatprep.subr.mxu0 %v3430_v6 }
 0x4c8   :  { %4200 = vmatpush3.msra.mxu0 %v3430_v6 }
 0x4c9   :  { %4201 = vmatprep.subr.mxu0 %v3429_v7 }
 0x4ca   :  { %4202 = vmatpush3.msra.mxu0 %v3429_v7 }
 0x4cb   :  { %4203 = vmatprep.subr.mxu0 %v3428_v8 }
 0x4cc   :  { %4204 = vmatpush3.msra.mxu0 %v3428_v8 }
 0x4cd   :  { %4205 = vmatprep.subr.mxu0 %v3427_v9 }
 0x4ce   :  { %4206 = vmatpush3.msra.mxu0 %v3427_v9 }
 0x4cf   :  { %4207 = vmatprep.subr.mxu0 %v3426_v12 }
 0x4d0   :  { %4208 = vmatpush3.msra.mxu0 %v3426_v12 }
 0x4d1   :  { %4209 = vmatprep.subr.mxu0 %v3425_v13 }
 0x4d2   :  { %4210 = vmatpush3.msra.mxu0 %v3425_v13 }
 0x57b   :  { %v4155_v35 = vpop.f32.mrf.mxu0 }
 0x57c   :  { %v754_v54 = vmax.f32 %v4155_v35, 0.0 }
 0x57d   :  { %v714_v36 = vpop.f32.mrf.mxu0 }
 0x57e   :  { %v753_v55 = vmax.f32 %v714_v36, 0.0 }
 0x57f   :  { %v4158_v37 = vpop.f32.mrf.mxu0 }
 0x580   :  { %v756_v51 = vmax.f32 %v4158_v37, 0.0 }
 0x581   :  { %v724_v38 = vpop.f32.mrf.mxu0 }
 0x582   :  { %v755_v52 = vmax.f32 %v724_v38, 0.0 }
 0x583   :  { %v4161_v40 = vpop.f32.mrf.mxu0 }
 0x584   :  { %v758_v49 = vmax.f32 %v4161_v40, 0.0 }
 0x585   :  { %v734_v42 = vpop.f32.mrf.mxu0 }
 0x586   :  { %v757_v50 = vmax.f32 %v734_v42, 0.0 }
 0x587   :  { %v4164_v44 = vpop.f32.mrf.mxu0 }
 0x588   :  { %v760_v45 = vmax.f32 %v4164_v44, 0.0 }
 0x589   :  { %v744_v47 = vpop.f32.mrf.mxu0 }
 0x58a   :  { %v759_v48 = vmax.f32 %v744_v47, 0.0  ;;  %4165 = vmatprep.subr.mxu1 %v760_v45 }
 0x58b   :  { %4166 = vmatpush3.msra.mxu1 %v760_v45 }
 0x58c   :  { %4167 = vmatprep.subr.mxu1 %v759_v48 }
 0x58d   :  { %4168 = vmatpush3.msra.mxu1 %v759_v48 }
 0x58e   :  { %4169 = vmatprep.subr.mxu1 %v758_v49 }
 0x58f   :  { %4170 = vmatpush3.msra.mxu1 %v758_v49 }
 0x590   :  { %4171 = vmatprep.subr.mxu1 %v757_v50 }
 0x591   :  { %4172 = vmatpush3.msra.mxu1 %v757_v50 }
 0x592   :  { %4173 = vmatprep.subr.mxu1 %v756_v51 }
 0x593   :  { %4174 = vmatpush3.msra.mxu1 %v756_v51 }
 0x594   :  { %4175 = vmatprep.subr.mxu1 %v755_v52 }
 0x595   :  { %4176 = vmatpush3.msra.mxu1 %v755_v52 }
 0x596   :  { %4177 = vmatprep.subr.mxu1 %v754_v54 }
 0x597   :  { %4178 = vmatpush3.msra.mxu1 %v754_v54 }
 0x598   :  { %4179 = vmatprep.subr.mxu1 %v753_v55 }
 0x599   :  { %4180 = vmatpush3.msra.mxu1 %v753_v55 }
 0x59a   :  { %4182 = vmatmul.mubr.msk.f32.vlgmr.msra.gmra.mxu1 %vm388_vm6, %v4805_v24 }
 0x59b   :  { %4184 = vmatprep.mubr.msk.f32.mxu1 %vm388_vm6, %v4810_v27 }
 0x59e   :  { %4185 = vmatmul.mubr.msk.f32.gmra.mxu1 %vm388_vm6, %v4819_v28 }
 0x59f   :  { %4225 = vmatprep.mubr.msk.f32.mxu1 %vm246_vm4, %v4740_v53 }
 0x65a   :  { %v4957_v16 = vpop.f32.mrf.mxu1 }
 0x65b   :  { %v851_v17 = vmul.f32 %v4957_v16, %v4688_v14  ;;  %v855_v23 = vmul.f32 %v4957_v16, %v4690_v15  ;;  %v847_v47 = vmul.f32 %v4957_v16, %v4717_v31 }
 0x65c   :  { %v4961_v18 = vpop.f32.mrf.mxu1 }
 0x65d   :  { %864 = vrot.lane.b32.xlu1 %v851_v17, %s4636_s15  ;;  %v850_v20 = vmul.f32 %v4961_v18, %v4682_v11  ;;  %v854_v33 = vmul.f32 %v4961_v18, %v4680_v10  ;;  %v846_v44 = vmul.f32 %v4961_v18, %v4713_v29 }
 0x65e   :  { %v4966_v22 = vpop.f32.mrf.mxu1 }
 0x65f   :  { %862 = vrot.lane.b32.xlu0 %v850_v20, %s4636_s15  ;;  %v853_v35 = vmul.f32 %v4966_v22, %v4702_v21  ;;  %v857_v37 = vmul.f32 %v4966_v22, %v4709_v26  ;;  %v849_v57 = vmul.f32 %v4966_v22, %v4719_v32 }
 0x660   :  { %v4974_v34 = vpop.f32.mrf.mxu1 }
 0x661   :  { %880 = vrot.lane.b32.xlu1 %v855_v23, %s4637_s12  ;;  %v852_v36 = vmul.f32 %v4974_v34, %v4697_v19  ;;  %v856_v38 = vmul.f32 %v4974_v34, %v4707_v25  ;;  %v848_v56 = vmul.f32 %v4974_v34, %v4715_v30 }
 0x663   :  { %878 = vrot.lane.b32.xlu0 %v854_v33, %s4637_s12 }
 0x665   :  { %868 = vrot.lane.b32.xlu1 %v853_v35, %s4636_s15 }
 0x667   :  { %866 = vrot.lane.b32.xlu0 %v852_v36, %s4636_s15 }
 0x669   :  { %884 = vrot.lane.b32.xlu1 %v857_v37, %s4637_s12 }
 0x66b   :  { %882 = vrot.lane.b32.xlu0 %v856_v38, %s4637_s12 }
 0x6cf   :  { %v865_v40 = vpop.permute.xlu1 %864 }
 0x6d0   :  { %v891_v50 = vsel %vm535_vm8, %v847_v47, %v865_v40 }
 0x6d1   :  { %v863_v42 = vpop.permute.xlu0 %862 }
 0x6d2   :  { %v890_v48 = vsel %vm535_vm8, %v846_v44, %v863_v42 }
 0x6d3   :  { %v881_v45 = vpop.permute.xlu1 %880 }
 0x6d4   :  { %v895_v52 = vsel %vm388_vm6, %v891_v50, %v881_v45 }
 0x6d5   :  { %v879_v49 = vpop.permute.xlu0 %878 }
 0x6d6   :  { %v894_v51 = vsel %vm388_vm6, %v890_v48, %v879_v49 }
 0x6d7   :  { %4211 = vmatprep.mubr.msk.f32.mxu0 %vm911_vm10, %v894_v51  ;;  %v869_v54 = vpop.permute.xlu1 %868  ;;  %v3469_v51 = vld [vmem:[%s5957_s1 + $0x4f8] sm:$0xff] }
 0x6d8   :  { %4212 = vmatmul.mubr.msk.f32.vlgmr.msra.gmra.mxu0 %vm911_vm10, %v895_v52  ;;  %v893_v5 = vsel %vm535_vm8, %v849_v57, %v869_v54  ;;  %v4638_v52 = vmov 0.0   ;;  %v3468_v54 = vld [vmem:[%s5957_s1 + $0x4f0] sm:$0xff] }
 0x6d9   :  { %v867_v55 = vpop.permute.xlu0 %866  ;;  %1279 = vmatprep.subr.mxu0 %v4638_v52  ;;  %v3464_v57 = vld [vmem:[%s5957_s1 + $0x4d0] sm:$0xff] }
 0x6da   :  { %v892_v3 = vsel %vm535_vm8, %v848_v56, %v867_v55  ;;  %1280 = vmatpush1.msra.mxu0 %v3469_v51  ;;  %v3467_v55 = vld [vmem:[%s5957_s1 + $0x4e8] sm:$0xff]  ;;  %v3465_v56 = vld [vmem:[%s5957_s1 + $0x4d8] sm:$0xff] }
 0x6db   :  { %v885_v2 = vpop.permute.xlu1 %884  ;;  %1281 = vmatprep.subr.mxu0 %v4638_v52 }
 0x6dc   :  { %v897_v7 = vsel %vm388_vm6, %v893_v5, %v885_v2  ;;  %1282 = vmatpush1.msra.mxu0 %v3468_v54  ;;  %v3463_v2 = vld [vmem:[%s5957_s1 + $0x4c8] sm:$0xff]  ;;  %v3460_v5 = vld [vmem:[%s5957_s1 + $0x4b0] sm:$0xff] }
 0x6dd   :  { %v883_v4 = vpop.permute.xlu0 %882  ;;  %1283 = vmatprep.subr.mxu0 %v4638_v52 }
 0x6de   :  { %v896_v6 = vsel %vm388_vm6, %v892_v3, %v883_v4  ;;  %1284 = vmatpush1.msra.mxu0 %v3467_v55  ;;  %v3462_v3 = vld [vmem:[%s5957_s1 + $0x4c0] sm:$0xff]  ;;  %v3461_v4 = vld [vmem:[%s5957_s1 + $0x4b8] sm:$0xff] }
 0x6df   :  { %4214 = vmatprep.mubr.msk.f32.mxu0 %vm911_vm10, %v896_v6  ;;  %1285 = vmatprep.subr.mxu0 %v4638_v52  ;;  %v3459_v6 = vld [vmem:[%s5957_s1 + $0x4a8] sm:$0xff] }
 0x6e0   :  { %4215 = vmatmul.mubr.msk.f32.gmra.mxu0 %vm911_vm10, %v897_v7  ;;  %v3458_v7 = vld [vmem:[%s5957_s1 + $0x4a0] sm:$0xff] }
 0x798   :  { %v4213_v8 = vpop.f32.mrf.mxu0 }
 0x79a   :  { %v990_v9 = vpop.f32.mrf.mxu0 }
 0x7a0   :  { %v4216_v12 = vpop.f32.mrf.mxu0 }
 0x7a1   :  { %4217 = vmatprep.subr.msk.mxu1 %vm271_vm5, %v4216_v12 }
 0x7a2   :  { %v1000_v13 = vpop.f32.mrf.mxu0  ;;  %4218 = vmatpush3.msk.msra.mxu1 %vm271_vm5, %v4216_v12  ;;  %v3455_v12 = vld [vmem:[%s5957_s1 + $0x488] sm:$0xff] }
 0x7a3   :  { %4219 = vmatprep.subr.mxu1 %v1000_v13 }
 0x7a4   :  { %4220 = vmatpush3.msra.mxu1 %v1000_v13  ;;  %v3454_v13 = vld [vmem:[%s5957_s1 + $0x480] sm:$0xff] }
 0x7a5   :  { %4221 = vmatprep.subr.mxu1 %v4213_v8 }
 0x7a6   :  { %4222 = vmatpush3.msra.mxu1 %v4213_v8  ;;  %v3457_v8 = vld [vmem:[%s5957_s1 + $0x498] sm:$0xff] }
 0x7a7   :  { %4223 = vmatprep.subr.mxu1 %v990_v9 }
 0x7a8   :  { %4224 = vmatpush3.msra.mxu1 %v990_v9  ;;  %v3456_v9 = vld [vmem:[%s5957_s1 + $0x490] sm:$0xff] }
 0x7a9   :  { %4226 = vmatmul.mubr.msk.f32.vlgmr.msra.gmra.mxu1 %vm246_vm4, %v4749_v58 }
 0x7aa   :  { %4228 = vmatprep.mubr.msk.f32.mxu1 %vm246_vm4, %v4754_v59 }
 0x7ad   :  { %4229 = vmatmul.mubr.msk.f32.gmra.mxu1 %vm246_vm4, %v4763_v60 }
 0x7ae   :  { %4231 = vmatprep.mubr.msk.f32.mxu1 %vm246_vm4, %v4768_v61 }
 0x7b1   :  { %4232 = vmatmul.mubr.msk.f32.gmra.mxu1 %vm246_vm4, %v4777_v62 }
 0x7b2   :  { %4234 = vmatprep.mubr.msk.f32.mxu1 %vm246_vm4, %v4782_v63 }
 0x7b5   :  { %4235 = vmatmul.mubr.msk.f32.gmra.mxu1 %vm246_vm4, %v4791_v0 }
 0x7b6   :  { %4253 = vmatprep.mubr.msk.f32.mxu1 %vm388_vm6, %v4798_v1 }
 0x869   :  { %v4227_v17 = vpop.f32.mrf.mxu1 }
 0x86a   :  { %v1118_v49 = vmax.f32 %v4227_v17, 0.0  ;;  %v3477_v17 = vld [vmem:[%s5957_s1 + $0x538] sm:$0xff] }
 0x86b   :  { %v1078_v20 = vpop.f32.mrf.mxu1 }
 0x86c   :  { %v1117_v50 = vmax.f32 %v1078_v20, 0.0  ;;  %v3476_v20 = vld [vmem:[%s5957_s1 + $0x530] sm:$0xff] }
 0x86d   :  { %v4230_v23 = vpop.f32.mrf.mxu1 }
 0x86e   :  { %v1120_v47 = vmax.f32 %v4230_v23, 0.0  ;;  %v3475_v23 = vld [vmem:[%s5957_s1 + $0x528] sm:$0xff] }
 0x86f   :  { %v1088_v33 = vpop.f32.mrf.mxu1 }
 0x870   :  { %v1119_v48 = vmax.f32 %v1088_v33, 0.0  ;;  %v3474_v33 = vld [vmem:[%s5957_s1 + $0x520] sm:$0xff] }
 0x871   :  { %v4233_v35 = vpop.f32.mrf.mxu1 }
 0x872   :  { %v1122_v44 = vmax.f32 %v4233_v35, 0.0  ;;  %v3473_v35 = vld [vmem:[%s5957_s1 + $0x518] sm:$0xff] }
 0x873   :  { %v1098_v36 = vpop.f32.mrf.mxu1 }
 0x874   :  { %v1121_v45 = vmax.f32 %v1098_v36, 0.0  ;;  %v3472_v36 = vld [vmem:[%s5957_s1 + $0x510] sm:$0xff] }
 0x875   :  { %v4236_v37 = vpop.f32.mrf.mxu1 }
 0x876   :  { %v1124_v38 = vmax.f32 %v4236_v37, 0.0  ;;  %v3471_v37 = vld [vmem:[%s5957_s1 + $0x508] sm:$0xff] }
 0x877   :  { %v1108_v40 = vpop.f32.mrf.mxu1 }
 0x878   :  { %v1123_v42 = vmax.f32 %v1108_v40, 0.0  ;;  %4237 = vmatprep.subr.mxu1 %v1124_v38 }
 0x879   :  { %4238 = vmatpush3.msra.mxu1 %v1124_v38  ;;  %v3470_v38 = vld [vmem:[%s5957_s1 + $0x500] sm:$0xff] }
 0x87a   :  { %4239 = vmatprep.subr.mxu1 %v1123_v42 }
 0x87b   :  { %4240 = vmatpush3.msra.mxu1 %v1123_v42 }
 0x87c   :  { %4241 = vmatprep.subr.mxu1 %v1122_v44 }
 0x87d   :  { %4242 = vmatpush3.msra.mxu1 %v1122_v44 }
 0x87e   :  { %4243 = vmatprep.subr.mxu1 %v1121_v45 }
 0x87f   :  { %4244 = vmatpush3.msra.mxu1 %v1121_v45 }
 0x880   :  { %4245 = vmatprep.subr.mxu1 %v1120_v47 }
 0x881   :  { %4246 = vmatpush3.msra.mxu1 %v1120_v47 }
 0x882   :  { %4247 = vmatprep.subr.mxu1 %v1119_v48 }
 0x883   :  { %4248 = vmatpush3.msra.mxu1 %v1119_v48 }
 0x884   :  { %4249 = vmatprep.subr.mxu1 %v1118_v49 }
 0x885   :  { %4250 = vmatpush3.msra.mxu1 %v1118_v49 }
 0x886   :  { %4251 = vmatprep.subr.mxu1 %v1117_v50 }
 0x887   :  { %4252 = vmatpush3.msra.mxu1 %v1117_v50 }
 0x888   :  { %4254 = vmatmul.mubr.msk.f32.vlgmr.msra.gmra.mxu1 %vm388_vm6, %v4805_v24 }
 0x889   :  { %4256 = vmatprep.mubr.msk.f32.mxu1 %vm388_vm6, %v4810_v27 }
 0x88c   :  { %4257 = vmatmul.mubr.msk.f32.gmra.mxu1 %vm388_vm6, %v4819_v28 }
 0x88d   :  { %4267 = vmatprep.mubr.msk.f32.mxu1 %vm246_vm4, %v4740_v53  ;;  %v3466_v53 = vld [vmem:[%s5957_s1 + $0x4e0] sm:$0xff] }
 0x88e   :  { %1286 = vmatpush1.msra.mxu0 %v3466_v53 }
 0x88f   :  { %1287 = vmatprep.subr.mxu0 %v4638_v52 }
 0x890   :  { %1288 = vmatpush1.msra.mxu0 %v3465_v56 }
 0x891   :  { %1289 = vmatprep.subr.mxu0 %v4638_v52 }
 0x892   :  { %1290 = vmatpush1.msra.mxu0 %v3464_v57 }
 0x893   :  { %1291 = vmatprep.subr.mxu0 %v4638_v52 }
 0x894   :  { %1292 = vmatpush1.msra.mxu0 %v3463_v2 }
 0x895   :  { %1293 = vmatprep.subr.mxu0 %v4638_v52 }
 0x896   :  { %1294 = vmatpush1.msra.mxu0 %v3462_v3 }
 0x897   :  { %1295 = vmatprep.subr.mxu0 %v4638_v52 }
 0x898   :  { %1296 = vmatpush1.msra.mxu0 %v3461_v4 }
 0x899   :  { %1297 = vmatprep.subr.mxu0 %v4638_v52 }
 0x89a   :  { %1298 = vmatpush1.msra.mxu0 %v3460_v5 }
 0x89b   :  { %1299 = vmatprep.subr.mxu0 %v4638_v52 }
 0x89c   :  { %1300 = vmatpush1.msra.mxu0 %v3459_v6 }
 0x89d   :  { %1301 = vmatprep.subr.mxu0 %v4638_v52 }
 0x89e   :  { %1302 = vmatpush1.msra.mxu0 %v3458_v7 }
 0x89f   :  { %1303 = vmatprep.subr.mxu0 %v4638_v52 }
 0x8a0   :  { %1304 = vmatpush1.msra.mxu0 %v3457_v8 }
 0x8a1   :  { %1305 = vmatprep.subr.mxu0 %v4638_v52 }
 0x8a2   :  { %1306 = vmatpush1.msra.mxu0 %v3456_v9 }
 0x8a3   :  { %1307 = vmatprep.subr.mxu0 %v4638_v52 }
 0x8a4   :  { %1308 = vmatpush1.msra.mxu0 %v3455_v12 }
 0x8a5   :  { %1309 = vmatprep.subr.mxu0 %v4638_v52 }
 0x8a6   :  { %1310 = vmatpush1.msra.mxu0 %v3454_v13 }
 0x8a7   :  { %1327 = vmatprep.subr.mxu0 %v4638_v52 }
 0x8a8   :  { %1328 = vmatpush2.msra.mxu0 %v3477_v17 }
 0x8a9   :  { %1329 = vmatprep.subr.mxu0 %v4638_v52 }
 0x8aa   :  { %1330 = vmatpush2.msra.mxu0 %v3476_v20 }
 0x8ab   :  { %1331 = vmatprep.subr.mxu0 %v4638_v52 }
 0x8ac   :  { %1332 = vmatpush2.msra.mxu0 %v3475_v23 }
 0x8ad   :  { %1333 = vmatprep.subr.mxu0 %v4638_v52 }
 0x8ae   :  { %1334 = vmatpush2.msra.mxu0 %v3474_v33 }
 0x8af   :  { %1335 = vmatprep.subr.mxu0 %v4638_v52 }
 0x8b0   :  { %1336 = vmatpush2.msra.mxu0 %v3473_v35  ;;  %v3534_v35 = vld [vmem:[%s5957_s1 + $0x738] sm:$0xff] }
 0x8b1   :  { %1337 = vmatprep.subr.mxu0 %v4638_v52 }
 0x8b2   :  { %1338 = vmatpush2.msra.mxu0 %v3472_v36  ;;  %v3533_v36 = vld [vmem:[%s5957_s1 + $0x730] sm:$0xff] }
 0x8b3   :  { %1339 = vmatprep.subr.mxu0 %v4638_v52 }
 0x8b4   :  { %1340 = vmatpush2.msra.mxu0 %v3471_v37  ;;  %v3532_v37 = vld [vmem:[%s5957_s1 + $0x728] sm:$0xff] }
 0x8b5   :  { %1341 = vmatprep.subr.mxu0 %v4638_v52 }
 0x8b6   :  { %1342 = vmatpush2.msra.mxu0 %v3470_v38  ;;  %v3531_v38 = vld [vmem:[%s5957_s1 + $0x720] sm:$0xff] }
 0x948   :  { %v4255_v40 = vpop.f32.mrf.mxu1 }
 0x949   :  { %v1215_v42 = vmul.f32 %v4255_v40, %v4688_v14  ;;  %v1219_v53 = vmul.f32 %v4255_v40, %v4690_v15 }
 0x94a   :  { %v1191_v44 = vpop.f32.mrf.mxu1 }
 0x94b   :  { %v1218_v45 = vmul.f32 %v1191_v44, %v4680_v10  ;;  %1228 = vrot.lane.b32.xlu1 %v1215_v42, %s4637_s12  ;;  %v1214_v47 = vmul.f32 %v1191_v44, %v4682_v11  ;;  %v1210_v54 = vmul.f32 %v1191_v44, %v4713_v29 }
 0x94c   :  { %v4258_v48 = vpop.f32.mrf.mxu1 }
 0x94d   :  { %3478 = vmatprep.mubr.msk.f32.mxu0 %vm388_vm6, %v1218_v45  ;;  %1226 = vrot.lane.b32.xlu0 %v1214_v47, %s4637_s12  ;;  %v1217_v49 = vmul.f32 %v4258_v48, %v4702_v21  ;;  %v1221_v3 = vmul.f32 %v4258_v48, %v4709_v26  ;;  %v1213_v6 = vmul.f32 %v4258_v48, %v4719_v32 }
 0x94e   :  { %v1201_v50 = vpop.f32.mrf.mxu1 }
 0x94f   :  { %1232 = vrot.lane.b32.xlu1 %v1217_v49, %s4637_s12  ;;  %v1216_v51 = vmul.f32 %v1201_v50, %v4697_v19 }
 0x951   :  { %1230 = vrot.lane.b32.xlu0 %v1216_v51, %s4637_s12 }
 0x953   :  { %1804 = vrot.lane.b32.xlu1 %v1201_v50, %s4637_s12 }
 0x955   :  { %1806 = vrot.lane.b32.xlu0 %v4258_v48, %s4637_s12 }
 0x957   :  { %1800 = vrot.lane.b32.xlu1 %v1191_v44, %s4637_s12 }
 0x959   :  { %1802 = vrot.lane.b32.xlu0 %v4255_v40, %s4637_s12 }
 0x95b   :  { %2256 = vrot.lane.b32.xlu1 %v4974_v34, %s4636_s15  ;;  %v1211_v34 = vmul.f32 %v4255_v40, %v4717_v31  ;;  %v3530_v40 = vld [vmem:[%s5957_s1 + $0x718] sm:$0xff] }
 0x95d   :  { %2258 = vrot.lane.b32.xlu0 %v4966_v22, %s4636_s15  ;;  %v1220_v22 = vmul.f32 %v1201_v50, %v4707_v25 }
 0x95f   :  { %2252 = vrot.lane.b32.xlu1 %v4961_v18, %s4636_s15 }
 0x961   :  { %2254 = vrot.lane.b32.xlu0 %v4957_v16, %s4636_s15  ;;  %v1212_v16 = vmul.f32 %v1201_v50, %v4715_v30 }
 0x9bd   :  { %v1229_v57 = vpop.permute.xlu1 %1228 }
 0x9be   :  { %v1239_v18 = vsel %vm388_vm6, %v1211_v34, %v1229_v57 }
 0x9bf   :  { %v1227_v55 = vpop.permute.xlu0 %1226 }
 0x9c0   :  { %v1238_v56 = vsel %vm388_vm6, %v1210_v54, %v1227_v55 }
 0x9c1   :  { %1344 = vmatmul.mubr.f32.vlgmr.msra.gmra.mxu0 %v1238_v56  ;;  %v1233_v5 = vpop.permute.xlu1 %1232 }
 0x9c2   :  { %3479 = vmatprep.mubr.msk.f32.mxu0 %vm388_vm6, %v1219_v53  ;;  %v1241_v7 = vsel %vm388_vm6, %v1213_v6, %v1233_v5  ;;  %v3524_v5 = vld [vmem:[%s5957_s1 + $0x6e8] sm:$0xff] }
 0x9c3   :  { %v1231_v2 = vpop.permute.xlu0 %1230  ;;  %v3508_v6 = vld [vmem:[%s5957_s1 + $0x668] sm:$0xff] }
 0x9c4   :  { %v1240_v4 = vsel %vm388_vm6, %v1212_v16, %v1231_v2  ;;  %v3526_v2 = vld [vmem:[%s5957_s1 + $0x6f8] sm:$0xff] }
 0x9c5   :  { %1349 = vmatmul.mubr.f32.gmra.mxu0 %v1239_v18  ;;  %v3510_v16 = vld [vmem:[%s5957_s1 + $0x678] sm:$0xff] }
 0x9c6   :  { %3480 = vmatprep.mubr.msk.f32.mxu0 %vm388_vm6, %v1220_v22 }
 0x9c9   :  { %1354 = vmatmul.mubr.f32.gmra.mxu0 %v1240_v4  ;;  %v3509_v4 = vld [vmem:[%s5957_s1 + $0x670] sm:$0xff] }
 0x9ca   :  { %3481 = vmatprep.mubr.msk.f32.mxu0 %vm388_vm6, %v1221_v3  ;;  %v3525_v3 = vld [vmem:[%s5957_s1 + $0x6f0] sm:$0xff] }
 0x9cd   :  { %1359 = vmatmul.mubr.f32.gmra.mxu0 %v1241_v7  ;;  %v3522_v7 = vld [vmem:[%s5957_s1 + $0x6d8] sm:$0xff] }
 0xa81   :  { %v1345_v8 = vpop.f32.mrf.mxu0 }
 0xa83   :  { %v1347_v9 = vpop.f32.mrf.mxu0 }
 0xa84   :  { %v3505_v9 = vld [vmem:[%s5957_s1 + $0x650] sm:$0xff] }
 0xa85   :  { %v1350_v12 = vpop.f32.mrf.mxu0 }
 0xa87   :  { %v1352_v13 = vpop.f32.mrf.mxu0 }
 0xa88   :  { %v3504_v13 = vld [vmem:[%s5957_s1 + $0x648] sm:$0xff] }
 0xa89   :  { %v1355_v17 = vpop.f32.mrf.mxu0 }
 0xa8b   :  { %v1357_v20 = vpop.f32.mrf.mxu0 }
 0xa8c   :  { %v3503_v20 = vld [vmem:[%s5957_s1 + $0x640] sm:$0xff] }
 0xa8d   :  { %v1360_v23 = vpop.f32.mrf.mxu0 }
 0xa8e   :  { %4259 = vmatprep.subr.msk.mxu1 %vm271_vm5, %v1360_v23 }
 0xa8f   :  { %v1362_v33 = vpop.f32.mrf.mxu0  ;;  %4260 = vmatpush3.msk.msra.mxu1 %vm271_vm5, %v1360_v23  ;;  %v3518_v23 = vld [vmem:[%s5957_s1 + $0x6b8] sm:$0xff] }
 0xa90   :  { %4261 = vmatprep.subr.mxu1 %v1355_v17  ;;  %v3502_v33 = vld [vmem:[%s5957_s1 + $0x638] sm:$0xff] }
 0xa91   :  { %4262 = vmatpush3.msra.mxu1 %v1355_v17  ;;  %v3519_v17 = vld [vmem:[%s5957_s1 + $0x6c0] sm:$0xff] }
 0xa92   :  { %4263 = vmatprep.subr.mxu1 %v1350_v12 }
 0xa93   :  { %4264 = vmatpush3.msra.mxu1 %v1350_v12  ;;  %v3520_v12 = vld [vmem:[%s5957_s1 + $0x6c8] sm:$0xff] }
 0xa94   :  { %4265 = vmatprep.subr.mxu1 %v1345_v8 }
 0xa95   :  { %4266 = vmatpush3.msra.mxu1 %v1345_v8  ;;  %v3506_v8 = vld [vmem:[%s5957_s1 + $0x658] sm:$0xff] }
 0xa96   :  { %4268 = vmatmul.mubr.msk.f32.vlgmr.msra.gmra.mxu1 %vm246_vm4, %v4749_v58  ;;  %v3542_v58 = vld [vmem:[%s5957_s1 + $0x778] sm:$0xff] }
 0xa97   :  { %4270 = vmatprep.mubr.msk.f32.mxu1 %vm246_vm4, %v4754_v59  ;;  %4301 = vmatprep.subr.mxu0 %v3542_v58  ;;  %v3541_v59 = vld [vmem:[%s5957_s1 + $0x770] sm:$0xff] }
 0xa98   :  { %4302 = vmatpush3.msra.mxu0 %v3542_v58  ;;  %v3517_v58 = vld [vmem:[%s5957_s1 + $0x6b0] sm:$0xff] }
 0xa99   :  { %4303 = vmatprep.subr.mxu0 %v3541_v59 }
 0xa9a   :  { %4271 = vmatmul.mubr.msk.f32.gmra.mxu1 %vm246_vm4, %v4763_v60  ;;  %v3540_v60 = vld [vmem:[%s5957_s1 + $0x768] sm:$0xff]  ;;  %4304 = vmatpush3.msra.mxu0 %v3541_v59  ;;  %v3501_v59 = vld [vmem:[%s5957_s1 + $0x630] sm:$0xff] }
 0xa9b   :  { %4273 = vmatprep.mubr.msk.f32.mxu1 %vm246_vm4, %v4768_v61  ;;  %v3539_v61 = vld [vmem:[%s5957_s1 + $0x760] sm:$0xff]  ;;  %4305 = vmatprep.subr.mxu0 %v3540_v60 }
 0xa9c   :  { %4306 = vmatpush3.msra.mxu0 %v3540_v60  ;;  %v3516_v60 = vld [vmem:[%s5957_s1 + $0x6a8] sm:$0xff] }
 0xa9d   :  { %4307 = vmatprep.subr.mxu0 %v3539_v61 }
 0xa9e   :  { %4274 = vmatmul.mubr.msk.f32.gmra.mxu1 %vm246_vm4, %v4777_v62  ;;  %v3538_v62 = vld [vmem:[%s5957_s1 + $0x758] sm:$0xff]  ;;  %4308 = vmatpush3.msra.mxu0 %v3539_v61  ;;  %v3500_v61 = vld [vmem:[%s5957_s1 + $0x628] sm:$0xff] }
 0xa9f   :  { %4276 = vmatprep.mubr.msk.f32.mxu1 %vm246_vm4, %v4782_v63  ;;  %v3537_v63 = vld [vmem:[%s5957_s1 + $0x750] sm:$0xff]  ;;  %4309 = vmatprep.subr.mxu0 %v3538_v62 }
 0xaa0   :  { %4310 = vmatpush3.msra.mxu0 %v3538_v62  ;;  %v3515_v62 = vld [vmem:[%s5957_s1 + $0x6a0] sm:$0xff] }
 0xaa1   :  { %4311 = vmatprep.subr.mxu0 %v3537_v63 }
 0xaa2   :  { %4277 = vmatmul.mubr.msk.f32.gmra.mxu1 %vm246_vm4, %v4791_v0  ;;  %v3536_v0 = vld [vmem:[%s5957_s1 + $0x748] sm:$0xff]  ;;  %4312 = vmatpush3.msra.mxu0 %v3537_v63  ;;  %v3499_v63 = vld [vmem:[%s5957_s1 + $0x620] sm:$0xff] }
 0xaa3   :  { %4295 = vmatprep.mubr.msk.f32.mxu1 %vm388_vm6, %v4798_v1  ;;  %v3535_v1 = vld [vmem:[%s5957_s1 + $0x740] sm:$0xff]  ;;  %4313 = vmatprep.subr.mxu0 %v3536_v0 }
 0xaa4   :  { %4314 = vmatpush3.msra.mxu0 %v3536_v0  ;;  %v3514_v0 = vld [vmem:[%s5957_s1 + $0x698] sm:$0xff] }
 0xaa5   :  { %4315 = vmatprep.subr.mxu0 %v3535_v1 }
 0xaa6   :  { %4316 = vmatpush3.msra.mxu0 %v3535_v1  ;;  %v3498_v1 = vld [vmem:[%s5957_s1 + $0x618] sm:$0xff] }
 0xaa7   :  { %4317 = vmatprep.subr.mxu0 %v3534_v35 }
 0xaa8   :  { %4318 = vmatpush3.msra.mxu0 %v3534_v35  ;;  %v3513_v35 = vld [vmem:[%s5957_s1 + $0x690] sm:$0xff] }
 0xaa9   :  { %4319 = vmatprep.subr.mxu0 %v3533_v36 }
 0xaaa   :  { %4320 = vmatpush3.msra.mxu0 %v3533_v36  ;;  %v3529_v36 = vld [vmem:[%s5957_s1 + $0x710] sm:$0xff] }
 0xaab   :  { %4321 = vmatprep.subr.mxu0 %v3532_v37 }
 0xaac   :  { %4322 = vmatpush3.msra.mxu0 %v3532_v37  ;;  %v3497_v37 = vld [vmem:[%s5957_s1 + $0x610] sm:$0xff] }
 0xaad   :  { %4323 = vmatprep.subr.mxu0 %v3531_v38 }
 0xaae   :  { %4324 = vmatpush3.msra.mxu0 %v3531_v38  ;;  %v3512_v38 = vld [vmem:[%s5957_s1 + $0x688] sm:$0xff] }
 0xaaf   :  { %4325 = vmatprep.subr.mxu0 %v3530_v40 }
 0xab0   :  { %4326 = vmatpush3.msra.mxu0 %v3530_v40  ;;  %v3528_v40 = vld [vmem:[%s5957_s1 + $0x708] sm:$0xff] }
 0xab1   :  { %4327 = vmatprep.subr.mxu0 %v3529_v36 }
 0xab2   :  { %4328 = vmatpush3.msra.mxu0 %v3529_v36 }
 0xab3   :  { %4329 = vmatprep.subr.mxu0 %v3528_v40 }
 0xab4   :  { %4330 = vmatpush3.msra.mxu0 %v3528_v40 }
 0xb56   :  { %v4269_v42 = vpop.f32.mrf.mxu1 }
 0xb57   :  { %v1473_v22 = vmax.f32 %v4269_v42, 0.0  ;;  %v3496_v42 = vld [vmem:[%s5957_s1 + $0x608] sm:$0xff] }
 0xb58   :  { %v1433_v44 = vpop.f32.mrf.mxu1 }
 0xb59   :  { %v1472_v18 = vmax.f32 %v1433_v44, 0.0  ;;  %v3511_v44 = vld [vmem:[%s5957_s1 + $0x680] sm:$0xff] }
 0xb5a   :  { %v4272_v45 = vpop.f32.mrf.mxu1 }
 0xb5b   :  { %v1475_v57 = vmax.f32 %v4272_v45, 0.0  ;;  %v3527_v45 = vld [vmem:[%s5957_s1 + $0x700] sm:$0xff] }
 0xb5c   :  { %v1443_v47 = vpop.f32.mrf.mxu1  ;;  %4331 = vmatprep.subr.mxu0 %v3527_v45 }
 0xb5d   :  { %v1474_v34 = vmax.f32 %v1443_v47, 0.0  ;;  %v3495_v47 = vld [vmem:[%s5957_s1 + $0x600] sm:$0xff]  ;;  %4332 = vmatpush3.msra.mxu0 %v3527_v45 }
 0xb5e   :  { %v4275_v48 = vpop.f32.mrf.mxu1 }
 0xb5f   :  { %v1477_v53 = vmax.f32 %v4275_v48, 0.0 }
 0xb60   :  { %v1453_v49 = vpop.f32.mrf.mxu1 }
 0xb61   :  { %v1476_v56 = vmax.f32 %v1453_v49, 0.0 }
 0xb62   :  { %v4278_v50 = vpop.f32.mrf.mxu1 }
 0xb63   :  { %v1479_v51 = vmax.f32 %v4278_v50, 0.0 }
 0xb64   :  { %v1463_v54 = vpop.f32.mrf.mxu1 }
 0xb65   :  { %v1478_v55 = vmax.f32 %v1463_v54, 0.0  ;;  %4279 = vmatprep.subr.mxu1 %v1479_v51 }
 0xb66   :  { %4280 = vmatpush3.msra.mxu1 %v1479_v51 }
 0xb67   :  { %4281 = vmatprep.subr.mxu1 %v1478_v55 }
 0xb68   :  { %4282 = vmatpush3.msra.mxu1 %v1478_v55 }
 0xb69   :  { %4283 = vmatprep.subr.mxu1 %v1477_v53 }
 0xb6a   :  { %4284 = vmatpush3.msra.mxu1 %v1477_v53 }
 0xb6b   :  { %4285 = vmatprep.subr.mxu1 %v1476_v56 }
 0xb6c   :  { %4286 = vmatpush3.msra.mxu1 %v1476_v56 }
 0xb6d   :  { %4287 = vmatprep.subr.mxu1 %v1475_v57 }
 0xb6e   :  { %4288 = vmatpush3.msra.mxu1 %v1475_v57 }
 0xb6f   :  { %4289 = vmatprep.subr.mxu1 %v1474_v34 }
 0xb70   :  { %4290 = vmatpush3.msra.mxu1 %v1474_v34 }
 0xb71   :  { %4291 = vmatprep.subr.mxu1 %v1473_v22 }
 0xb72   :  { %4292 = vmatpush3.msra.mxu1 %v1473_v22 }
 0xb73   :  { %4293 = vmatprep.subr.mxu1 %v1472_v18 }
 0xb74   :  { %4294 = vmatpush3.msra.mxu1 %v1472_v18 }
 0xb75   :  { %4296 = vmatmul.mubr.msk.f32.vlgmr.msra.gmra.mxu1 %vm388_vm6, %v4805_v24  ;;  %3825 = vmatprep.subr.mxu1 %v3526_v2  ;;  %v3523_v24 = vld [vmem:[%s5957_s1 + $0x6e0] sm:$0xff] }
 0xb76   :  { %4298 = vmatprep.mubr.msk.f32.mxu1 %vm388_vm6, %v4810_v27  ;;  %3826 = vmatpush3.msra.mxu1 %v3510_v16  ;;  %v3507_v27 = vld [vmem:[%s5957_s1 + $0x660] sm:$0xff] }
 0xb77   :  { %3827 = vmatprep.subr.mxu1 %v3525_v3  ;;  %v5347_v16 = vld [vmem:[%s5956_s2] sm:$0xff] }
 0xb78   :  { %3828 = vmatpush3.msra.mxu1 %v3509_v4 }
 0xb79   :  { %4299 = vmatmul.mubr.msk.f32.gmra.mxu1 %vm388_vm6, %v4819_v28  ;;  %3829 = vmatprep.subr.mxu1 %v3524_v5  ;;  %v3521_v28 = vld [vmem:[%s5957_s1 + $0x6d0] sm:$0xff] }
 0xb7a   :  { %3830 = vmatpush3.msra.mxu1 %v3508_v6  ;;  %v5357_v6 = vld [vmem:[%s5956_s2 + $0x40] sm:$0xff] }
 0xb7b   :  { %3831 = vmatprep.subr.mxu1 %v3523_v24 }
 0xb7c   :  { %3832 = vmatpush3.msra.mxu1 %v3507_v27 }
 0xb7d   :  { %3833 = vmatprep.subr.mxu1 %v3522_v7 }
 0xb7e   :  { %3834 = vmatpush3.msra.mxu1 %v3506_v8 }
 0xb7f   :  { %3835 = vmatprep.subr.mxu1 %v3521_v28 }
 0xb80   :  { %3836 = vmatpush3.msra.mxu1 %v3505_v9 }
 0xb81   :  { %3837 = vmatprep.subr.mxu1 %v3520_v12 }
 0xb82   :  { %3838 = vmatpush3.msra.mxu1 %v3504_v13 }
 0xb83   :  { %3839 = vmatprep.subr.mxu1 %v3519_v17 }
 0xb84   :  { %3840 = vmatpush3.msra.mxu1 %v3503_v20 }
 0xb85   :  { %3841 = vmatprep.subr.mxu1 %v3518_v23 }
 0xb86   :  { %3842 = vmatpush3.msra.mxu1 %v3502_v33 }
 0xb87   :  { %3843 = vmatprep.subr.mxu1 %v3517_v58 }
 0xb88   :  { %3844 = vmatpush3.msra.mxu1 %v3501_v59 }
 0xb89   :  { %3845 = vmatprep.subr.mxu1 %v3516_v60  ;;  %v1807_v60 = vpop.permute.xlu0 %1806 }
 0xb8a   :  { %3846 = vmatpush3.msra.mxu1 %v3500_v61 }
 0xb8b   :  { %3847 = vmatprep.subr.mxu1 %v3515_v62 }
 0xb8c   :  { %3848 = vmatpush3.msra.mxu1 %v3499_v63 }
 0xb8d   :  { %3849 = vmatprep.subr.mxu1 %v3514_v0  ;;  %v1803_v40 = vpop.permute.xlu0 %1802 }
 0xb8e   :  { %3850 = vmatpush3.msra.mxu1 %v3498_v1  ;;  %v1805_v1 = vpop.permute.xlu1 %1804 }
 0xb8f   :  { %3851 = vmatprep.subr.mxu1 %v3513_v35 }
 0xb90   :  { %3852 = vmatpush3.msra.mxu1 %v3497_v37 }
 0xb91   :  { %3853 = vmatprep.subr.mxu1 %v3512_v38 }
 0xb92   :  { %3854 = vmatpush3.msra.mxu1 %v3496_v42 }
 0xb93   :  { %3855 = vmatprep.subr.mxu1 %v3511_v44  ;;  %v1801_v44 = vpop.permute.xlu1 %1800 }
 0xb94   :  { %3856 = vmatpush3.msra.mxu1 %v3495_v47  ;;  %v5370_v47 = vld [vmem:[%s5956_s2 + $0x48] sm:$0xff] }
 0xc35   :  { %v4297_v48 = vpop.f32.mrf.mxu1 }
 0xc36   :  { %v1574_v55 = vmul.f32 %v4297_v48, %v4690_v15  ;;  %v1570_v56 = vmul.f32 %v4297_v48, %v4688_v14  ;;  %v1566_v22 = vmul.f32 %v4297_v48, %v4717_v31  ;;  %v5377_v48 = vld [vmem:[%s5956_s2 + $0x50] sm:$0xff] }
 0xc37   :  { %v1546_v49 = vpop.f32.mrf.mxu1 }
 0xc38   :  { %v1565_v50 = vmul.f32 %v1546_v49, %v4713_v29  ;;  %v1569_v51 = vmul.f32 %v1546_v49, %v4682_v11  ;;  %v1573_v54 = vmul.f32 %v1546_v49, %v4680_v10  ;;  %v5384_v49 = vld [vmem:[%s5956_s2 + $0x58] sm:$0xff] }
 0xc39   :  { %v4300_v53 = vpop.f32.mrf.mxu1 }
 0xc3a   :  { %1690 = vmatprep.mubr.f32.mxu1 %v1569_v51  ;;  %4333 = vmatprep.mubr.f32.mxu0 %v1573_v54  ;;  %v1576_v18 = vmul.f32 %v4300_v53, %v4709_v26  ;;  %v1572_v4 = vmul.f32 %v4300_v53, %v4702_v21  ;;  %v1568_v5 = vmul.f32 %v4300_v53, %v4719_v32  ;;  %v5398_v51 = vld [vmem:[%s5956_s2 + $0x68] sm:$0xff]  ;;  %v5405_v54 = vld [vmem:[%s5956_s2 + $0x70] sm:$0xff]  ;;  %v3587_v53 = vld [vmem:[%s5957_s1 + $0x878] sm:$0xff] }
 0xc3b   :  { %v1556_v57 = vpop.f32.mrf.mxu1  ;;  %1691 = vmatmul.mubr.f32.vlgmr.msra.gmra.mxu1 %v1565_v50  ;;  %4334 = vmatmul.mubr.f32.vlgmr.msra.gmra.mxu0 %v1574_v55  ;;  %v5391_v50 = vld [vmem:[%s5956_s2 + $0x60] sm:$0xff]  ;;  %v5412_v55 = vld [vmem:[%s5956_s2 + $0x78] sm:$0xff] }
 0xc3c   :  { %v1575_v34 = vmul.f32 %v1556_v57, %v4707_v25  ;;  %1695 = vmatprep.mubr.f32.mxu1 %v1570_v56  ;;  %v1571_v2 = vmul.f32 %v1556_v57, %v4697_v19  ;;  %v1567_v3 = vmul.f32 %v1556_v57, %v4715_v30  ;;  %v3571_v56 = vld [vmem:[%s5957_s1 + $0x7f8] sm:$0xff]  ;;  %v3586_v57 = vld [vmem:[%s5957_s1 + $0x870] sm:$0xff] }
 0xc3e   :  { %4336 = vmatprep.mubr.f32.mxu0 %v1575_v34  ;;  %v3570_v34 = vld [vmem:[%s5957_s1 + $0x7f0] sm:$0xff] }
 0xc3f   :  { %1696 = vmatmul.mubr.f32.gmra.mxu1 %v1566_v22  ;;  %4337 = vmatmul.mubr.f32.gmra.mxu0 %v1576_v18  ;;  %v3585_v22 = vld [vmem:[%s5957_s1 + $0x868] sm:$0xff] }
 0xc40   :  { %1700 = vmatprep.mubr.f32.mxu1 %v1571_v2  ;;  %4375 = vmatprep.mubr.msk.f32.mxu0 %vm388_vm6, %v5347_v16  ;;  %v3569_v18 = vld [vmem:[%s5957_s1 + $0x7e8] sm:$0xff]  ;;  %v3584_v2 = vld [vmem:[%s5957_s1 + $0x860] sm:$0xff] }
 0xc43   :  { %1701 = vmatmul.mubr.f32.gmra.mxu1 %v1567_v3  ;;  %v3568_v3 = vld [vmem:[%s5957_s1 + $0x7e0] sm:$0xff] }
 0xc44   :  { %1705 = vmatprep.mubr.f32.mxu1 %v1572_v4  ;;  %v3583_v4 = vld [vmem:[%s5957_s1 + $0x858] sm:$0xff] }
 0xc47   :  { %1706 = vmatmul.mubr.f32.gmra.mxu1 %v1568_v5  ;;  %v3567_v5 = vld [vmem:[%s5957_s1 + $0x7d8] sm:$0xff] }
 0xc48   :  { %4347 = vmatprep.mubr.msk.f32.mxu1 %vm246_vm4, %v5357_v6 }
 0xcfb   :  { %v3857_v24 = vpop.f32.mrf.mxu1  ;;  %v4335_v7 = vpop.f32.mrf.mxu0 }
 0xcfd   :  { %v3858_v27 = vpop.f32.mrf.mxu1  ;;  %v1777_v9 = vpop.f32.mrf.mxu0 }
 0xcfe   :  { %v3859_v62 = vadd.f32 %v3858_v27, %v3857_v24  ;;  %v3582_v24 = vld [vmem:[%s5957_s1 + $0x850] sm:$0xff] }
 0xcff   :  { %v3860_v8 = vpop.f32.mrf.mxu1  ;;  %v4338_v17 = vpop.f32.mrf.mxu0  ;;  %v3566_v27 = vld [vmem:[%s5957_s1 + $0x7d0] sm:$0xff] }
 0xd00   :  { %v1778_v37 = vadd.f32 %v3859_v62, %v1777_v9  ;;  %v3564_v9 = vld [vmem:[%s5957_s1 + $0x7c0] sm:$0xff] }
 0xd01   :  { %v3861_v28 = vpop.f32.mrf.mxu1  ;;  %v1787_v61 = vpop.f32.mrf.mxu0 }
 0xd02   :  { %v3862_v58 = vadd.f32 %v3861_v28, %v3860_v8  ;;  %v1812_v45 = vsel %vm388_vm6, %v1778_v37, %v1801_v44  ;;  %v3565_v8 = vld [vmem:[%s5957_s1 + $0x7c8] sm:$0xff]  ;;  %v3580_v28 = vld [vmem:[%s5957_s1 + $0x840] sm:$0xff] }
 0xd03   :  { %v3863_v12 = vpop.f32.mrf.mxu1 }
 0xd04   :  { %v1783_v35 = vadd.f32 %v4335_v7, %v3862_v58  ;;  %v3581_v7 = vld [vmem:[%s5957_s1 + $0x848] sm:$0xff]  ;;  %v3576_v58 = vld [vmem:[%s5957_s1 + $0x820] sm:$0xff] }
 0xd05   :  { %v3864_v13 = vpop.f32.mrf.mxu1 }
 0xd06   :  { %v3865_v23 = vadd.f32 %v3864_v13, %v3863_v12  ;;  %v1813_v42 = vsel %vm388_vm6, %v1783_v35, %v1803_v40  ;;  %v3579_v12 = vld [vmem:[%s5957_s1 + $0x838] sm:$0xff] }
 0xd07   :  { %v3866_v20 = vpop.f32.mrf.mxu1  ;;  %v3563_v13 = vld [vmem:[%s5957_s1 + $0x7b8] sm:$0xff] }
 0xd08   :  { %v1788_v63 = vadd.f32 %v3865_v23, %v1787_v61  ;;  %v3577_v23 = vld [vmem:[%s5957_s1 + $0x828] sm:$0xff]  ;;  %v3559_v61 = vld [vmem:[%s5957_s1 + $0x798] sm:$0xff] }
 0xd09   :  { %v3867_v33 = vpop.f32.mrf.mxu1 }
 0xd0a   :  { %v3868_v59 = vadd.f32 %v3867_v33, %v3866_v20  ;;  %v1814_v38 = vsel %vm388_vm6, %v1788_v63, %v1805_v1  ;;  %v3562_v20 = vld [vmem:[%s5957_s1 + $0x7b0] sm:$0xff]  ;;  %v3561_v33 = vld [vmem:[%s5957_s1 + $0x7a8] sm:$0xff] }
 0xd0c   :  { %v1793_v0 = vadd.f32 %v4338_v17, %v3868_v59  ;;  %v3578_v17 = vld [vmem:[%s5957_s1 + $0x830] sm:$0xff]  ;;  %v3560_v59 = vld [vmem:[%s5957_s1 + $0x7a0] sm:$0xff] }
 0xd0e   :  { %v1815_v36 = vsel %vm388_vm6, %v1793_v0, %v1807_v60  ;;  %v3575_v60 = vld [vmem:[%s5957_s1 + $0x818] sm:$0xff] }
 0xd0f   :  { %4339 = vmatprep.subr.msk.mxu1 %vm271_vm5, %v1815_v36 }
 0xd10   :  { %4340 = vmatpush3.msk.msra.mxu1 %vm271_vm5, %v1815_v36 }
 0xd11   :  { %4341 = vmatprep.subr.mxu1 %v1814_v38 }
 0xd12   :  { %4342 = vmatpush3.msra.mxu1 %v1814_v38 }
 0xd13   :  { %4343 = vmatprep.subr.mxu1 %v1813_v42 }
 0xd14   :  { %4344 = vmatpush3.msra.mxu1 %v1813_v42 }
 0xd15   :  { %4345 = vmatprep.subr.mxu1 %v1812_v45 }
 0xd16   :  { %4346 = vmatpush3.msra.mxu1 %v1812_v45 }
 0xd17   :  { %4348 = vmatmul.mubr.msk.f32.vlgmr.msra.gmra.mxu1 %vm246_vm4, %v5370_v47  ;;  %3913 = vmatprep.subr.mxu1 %v3587_v53 }
 0xd18   :  { %4350 = vmatprep.mubr.msk.f32.mxu1 %vm246_vm4, %v5377_v48  ;;  %3914 = vmatpush3.msra.mxu1 %v3571_v56 }
 0xd19   :  { %3915 = vmatprep.subr.mxu1 %v3586_v57 }
 0xd1a   :  { %3916 = vmatpush3.msra.mxu1 %v3570_v34 }
 0xd1b   :  { %4351 = vmatmul.mubr.msk.f32.gmra.mxu1 %vm246_vm4, %v5384_v49  ;;  %3917 = vmatprep.subr.mxu1 %v3585_v22  ;;  %v3603_v22 = vld [vmem:[%s5957_s1 + $0x8f8] sm:$0xff] }
 0xd1c   :  { %4353 = vmatprep.mubr.msk.f32.mxu1 %vm246_vm4, %v5391_v50  ;;  %3918 = vmatpush3.msra.mxu1 %v3569_v18  ;;  %v3602_v18 = vld [vmem:[%s5957_s1 + $0x8f0] sm:$0xff] }
 0xd1d   :  { %3919 = vmatprep.subr.mxu1 %v3584_v2  ;;  %v5503_v2 = vld [vmem:[%s5956_s2 + $0x8] sm:$0xff] }
 0xd1e   :  { %3920 = vmatpush3.msra.mxu1 %v3568_v3  ;;  %v5510_v3 = vld [vmem:[%s5956_s2 + $0x10] sm:$0xff] }
 0xd1f   :  { %4354 = vmatmul.mubr.msk.f32.gmra.mxu1 %vm246_vm4, %v5398_v51  ;;  %3921 = vmatprep.subr.mxu1 %v3583_v4  ;;  %v3601_v4 = vld [vmem:[%s5957_s1 + $0x8e8] sm:$0xff] }
 0xd20   :  { %4356 = vmatprep.mubr.msk.f32.mxu1 %vm246_vm4, %v5405_v54  ;;  %3922 = vmatpush3.msra.mxu1 %v3567_v5  ;;  %v3600_v5 = vld [vmem:[%s5957_s1 + $0x8e0] sm:$0xff] }
 0xd21   :  { %3923 = vmatprep.subr.mxu1 %v3582_v24  ;;  %v5523_v24 = vld [vmem:[%s5956_s2 + $0x18] sm:$0x3f] }
 0xd22   :  { %3924 = vmatpush3.msra.mxu1 %v3566_v27  ;;  %v3599_v27 = vld [vmem:[%s5957_s1 + $0x8d8] sm:$0xff] }
 0xd23   :  { %4357 = vmatmul.mubr.msk.f32.gmra.mxu1 %vm246_vm4, %v5412_v55  ;;  %3925 = vmatprep.subr.mxu1 %v3581_v7  ;;  %v3598_v7 = vld [vmem:[%s5957_s1 + $0x8d0] sm:$0xff] }
 0xd24   :  { %3926 = vmatpush3.msra.mxu1 %v3565_v8  ;;  %v3597_v8 = vld [vmem:[%s5957_s1 + $0x8c8] sm:$0xff] }
 0xd25   :  { %3927 = vmatprep.subr.mxu1 %v3580_v28  ;;  %v3596_v28 = vld [vmem:[%s5957_s1 + $0x8c0] sm:$0xff] }
 0xd26   :  { %3928 = vmatpush3.msra.mxu1 %v3564_v9  ;;  %v3595_v9 = vld [vmem:[%s5957_s1 + $0x8b8] sm:$0xff] }
 0xd27   :  { %3929 = vmatprep.subr.mxu1 %v3579_v12  ;;  %v3594_v12 = vld [vmem:[%s5957_s1 + $0x8b0] sm:$0xff] }
 0xd28   :  { %3930 = vmatpush3.msra.mxu1 %v3563_v13  ;;  %v3593_v13 = vld [vmem:[%s5957_s1 + $0x8a8] sm:$0xff] }
 0xd29   :  { %3931 = vmatprep.subr.mxu1 %v3578_v17  ;;  %v3592_v17 = vld [vmem:[%s5957_s1 + $0x8a0] sm:$0xff] }
 0xd2a   :  { %3932 = vmatpush3.msra.mxu1 %v3562_v20  ;;  %v3591_v20 = vld [vmem:[%s5957_s1 + $0x898] sm:$0xff] }
 0xd2b   :  { %3933 = vmatprep.subr.mxu1 %v3577_v23  ;;  %v3574_v23 = vld [vmem:[%s5957_s1 + $0x810] sm:$0xff] }
 0xd2c   :  { %3934 = vmatpush3.msra.mxu1 %v3561_v33  ;;  %v3590_v33 = vld [vmem:[%s5957_s1 + $0x890] sm:$0xff] }
 0xd2d   :  { %3935 = vmatprep.subr.mxu1 %v3576_v58  ;;  %v3558_v58 = vld [vmem:[%s5957_s1 + $0x790] sm:$0xff] }
 0xd2e   :  { %3936 = vmatpush3.msra.mxu1 %v3560_v59  ;;  %v3573_v59 = vld [vmem:[%s5957_s1 + $0x808] sm:$0xff] }
 0xd2f   :  { %3937 = vmatprep.subr.mxu1 %v3575_v60  ;;  %v3589_v60 = vld [vmem:[%s5957_s1 + $0x888] sm:$0xff] }
 0xd30   :  { %3938 = vmatpush3.msra.mxu1 %v3559_v61  ;;  %v3557_v61 = vld [vmem:[%s5957_s1 + $0x788] sm:$0xff] }
 0xd31   :  { %3939 = vmatprep.subr.mxu1 %v3574_v23 }
 0xd32   :  { %3940 = vmatpush3.msra.mxu1 %v3558_v58 }
 0xd33   :  { %3941 = vmatprep.subr.mxu1 %v3573_v59 }
 0xd34   :  { %3942 = vmatpush3.msra.mxu1 %v3557_v61 }
 0xdd7   :  { %v4349_v62 = vpop.f32.mrf.mxu1 }
 0xdd8   :  { %v1925_v57 = vmax.f32 %v4349_v62, 0.0  ;;  %v3572_v62 = vld [vmem:[%s5957_s1 + $0x800] sm:$0xff] }
 0xdd9   :  { %v1885_v63 = vpop.f32.mrf.mxu1  ;;  %3943 = vmatprep.subr.mxu1 %v3572_v62 }
 0xdda   :  { %v1924_v34 = vmax.f32 %v1885_v63, 0.0  ;;  %v3588_v63 = vld [vmem:[%s5957_s1 + $0x880] sm:$0xff] }
 0xddb   :  { %v4352_v0 = vpop.f32.mrf.mxu1 }
 0xddc   :  { %v1927_v53 = vmax.f32 %v4352_v0, 0.0  ;;  %v3556_v0 = vld [vmem:[%s5957_s1 + $0x780] sm:$0xff] }
 0xddd   :  { %v1895_v1 = vpop.f32.mrf.mxu1  ;;  %3944 = vmatpush3.msra.mxu1 %v3556_v0 }
 0xdde   :  { %v1926_v56 = vmax.f32 %v1895_v1, 0.0 }
 0xddf   :  { %v4355_v35 = vpop.f32.mrf.mxu1 }
 0xde0   :  { %v1929_v44 = vmax.f32 %v4355_v35, 0.0 }
 0xde1   :  { %v1905_v36 = vpop.f32.mrf.mxu1 }
 0xde2   :  { %v1928_v45 = vmax.f32 %v1905_v36, 0.0 }
 0xde3   :  { %v4358_v37 = vpop.f32.mrf.mxu1 }
 0xde4   :  { %v1931_v38 = vmax.f32 %v4358_v37, 0.0 }
 0xde5   :  { %v1915_v40 = vpop.f32.mrf.mxu1 }
 0xde6   :  { %v1930_v42 = vmax.f32 %v1915_v40, 0.0  ;;  %4359 = vmatprep.subr.mxu0 %v1931_v38 }
 0xde7   :  { %4360 = vmatpush3.msra.mxu0 %v1931_v38 }
 0xde8   :  { %4361 = vmatprep.subr.mxu0 %v1930_v42 }
 0xde9   :  { %4362 = vmatpush3.msra.mxu0 %v1930_v42 }
 0xdea   :  { %4363 = vmatprep.subr.mxu0 %v1929_v44 }
 0xdeb   :  { %4364 = vmatpush3.msra.mxu0 %v1929_v44 }
 0xdec   :  { %4365 = vmatprep.subr.mxu0 %v1928_v45 }
 0xded   :  { %4366 = vmatpush3.msra.mxu0 %v1928_v45 }
 0xdee   :  { %4367 = vmatprep.subr.mxu0 %v1927_v53 }
 0xdef   :  { %4368 = vmatpush3.msra.mxu0 %v1927_v53 }
 0xdf0   :  { %4369 = vmatprep.subr.mxu0 %v1926_v56 }
 0xdf1   :  { %4370 = vmatpush3.msra.mxu0 %v1926_v56 }
 0xdf2   :  { %4371 = vmatprep.subr.mxu0 %v1925_v57 }
 0xdf3   :  { %4372 = vmatpush3.msra.mxu0 %v1925_v57 }
 0xdf4   :  { %4373 = vmatprep.subr.mxu0 %v1924_v34 }
 0xdf5   :  { %4374 = vmatpush3.msra.mxu0 %v1924_v34 }
 0xdf6   :  { %4376 = vmatmul.mubr.msk.f32.vlgmr.msra.gmra.mxu0 %vm388_vm6, %v5503_v2  ;;  %4381 = vmatprep.subr.mxu0 %v3603_v22 }
 0xdf7   :  { %4378 = vmatprep.mubr.msk.f32.mxu0 %vm388_vm6, %v5510_v3  ;;  %4382 = vmatpush3.msra.mxu0 %v3603_v22 }
 0xdf8   :  { %4383 = vmatprep.subr.mxu0 %v3602_v18 }
 0xdf9   :  { %4384 = vmatpush3.msra.mxu0 %v3602_v18 }
 0xdfa   :  { %4379 = vmatmul.mubr.msk.f32.gmra.mxu0 %vm388_vm6, %v5523_v24  ;;  %4385 = vmatprep.subr.mxu0 %v3601_v4 }
 0xdfb   :  { %4386 = vmatpush3.msra.mxu0 %v3601_v4 }
 0xdfc   :  { %4387 = vmatprep.subr.mxu0 %v3600_v5 }
 0xdfd   :  { %4388 = vmatpush3.msra.mxu0 %v3600_v5 }
 0xdfe   :  { %4389 = vmatprep.subr.mxu0 %v3599_v27 }
 0xdff   :  { %4390 = vmatpush3.msra.mxu0 %v3599_v27 }
 0xe00   :  { %4391 = vmatprep.subr.mxu0 %v3598_v7 }
 0xe01   :  { %4392 = vmatpush3.msra.mxu0 %v3598_v7 }
 0xe02   :  { %4393 = vmatprep.subr.mxu0 %v3597_v8 }
 0xe03   :  { %4394 = vmatpush3.msra.mxu0 %v3597_v8 }
 0xe04   :  { %4395 = vmatprep.subr.mxu0 %v3596_v28 }
 0xe05   :  { %4396 = vmatpush3.msra.mxu0 %v3596_v28 }
 0xe06   :  { %4397 = vmatprep.subr.mxu0 %v3595_v9 }
 0xe07   :  { %4398 = vmatpush3.msra.mxu0 %v3595_v9 }
 0xe08   :  { %4399 = vmatprep.subr.mxu0 %v3594_v12 }
 0xe09   :  { %4400 = vmatpush3.msra.mxu0 %v3594_v12 }
 0xe0a   :  { %4401 = vmatprep.subr.mxu0 %v3593_v13 }
 0xe0b   :  { %4402 = vmatpush3.msra.mxu0 %v3593_v13 }
 0xe0c   :  { %4403 = vmatprep.subr.mxu0 %v3592_v17 }
 0xe0d   :  { %4404 = vmatpush3.msra.mxu0 %v3592_v17 }
 0xe0e   :  { %4405 = vmatprep.subr.mxu0 %v3591_v20 }
 0xe0f   :  { %4406 = vmatpush3.msra.mxu0 %v3591_v20 }
 0xe10   :  { %4407 = vmatprep.subr.mxu0 %v3590_v33 }
 0xe11   :  { %4408 = vmatpush3.msra.mxu0 %v3590_v33 }
 0xe12   :  { %4409 = vmatprep.subr.mxu0 %v3589_v60 }
 0xe13   :  { %4410 = vmatpush3.msra.mxu0 %v3589_v60  ;;  %v2259_v60 = vpop.permute.xlu0 %2258 }
 0xe14   :  { %4411 = vmatprep.subr.mxu0 %v3588_v63 }
 0xe15   :  { %4412 = vmatpush3.msra.mxu0 %v3588_v63 }
 0xeb6   :  { %v4377_v1 = vpop.f32.mrf.mxu0 }
 0xeb7   :  { %v2026_v40 = vmul.f32 %v4377_v1, %v4690_v15  ;;  %v2022_v44 = vmul.f32 %v4377_v1, %v4688_v14  ;;  %v2018_v56 = vmul.f32 %v4377_v1, %v4717_v31  ;;  %v2257_v1 = vpop.permute.xlu1 %2256 }
 0xeb8   :  { %v1998_v35 = vpop.f32.mrf.mxu0 }
 0xeb9   :  { %v2017_v36 = vmul.f32 %v1998_v35, %v4713_v29  ;;  %v2021_v37 = vmul.f32 %v1998_v35, %v4682_v11  ;;  %v2025_v38 = vmul.f32 %v1998_v35, %v4680_v10 }
 0xeba   :  { %v4380_v42 = vpop.f32.mrf.mxu0 }
 0xebb   :  { %2142 = vmatprep.mubr.f32.mxu1 %v2021_v37  ;;  %4413 = vmatprep.mubr.f32.mxu0 %v2025_v38  ;;  %v2028_v57 = vmul.f32 %v4380_v42, %v4709_v26  ;;  %v2024_v18 = vmul.f32 %v4380_v42, %v4702_v21  ;;  %v2020_v4 = vmul.f32 %v4380_v42, %v4719_v32 }
 0xebc   :  { %v2008_v45 = vpop.f32.mrf.mxu0  ;;  %2143 = vmatmul.mubr.f32.vlgmr.msra.gmra.mxu1 %v2017_v36  ;;  %4414 = vmatmul.mubr.f32.vlgmr.msra.gmra.mxu0 %v2026_v40  ;;  %v2255_v40 = vpop.permute.xlu0 %2254 }
 0xebd   :  { %v2027_v53 = vmul.f32 %v2008_v45, %v4707_v25  ;;  %2147 = vmatprep.mubr.f32.mxu1 %v2022_v44  ;;  %v2023_v34 = vmul.f32 %v2008_v45, %v4697_v19  ;;  %v2019_v22 = vmul.f32 %v2008_v45, %v4715_v30  ;;  %v2253_v44 = vpop.permute.xlu1 %2252 }
 0xebf   :  { %4416 = vmatprep.mubr.f32.mxu0 %v2027_v53 }
 0xec0   :  { %2148 = vmatmul.mubr.f32.gmra.mxu1 %v2018_v56  ;;  %4417 = vmatmul.mubr.f32.gmra.mxu0 %v2028_v57 }
 0xec1   :  { %2152 = vmatprep.mubr.f32.mxu1 %v2023_v34  ;;  %4455 = vmatprep.mubr.msk.f32.mxu0 %vm388_vm6, %v5347_v16 }
 0xec4   :  { %2153 = vmatmul.mubr.f32.gmra.mxu1 %v2019_v22 }
 0xec5   :  { %2157 = vmatprep.mubr.f32.mxu1 %v2024_v18 }
 0xec8   :  { %2158 = vmatmul.mubr.f32.gmra.mxu1 %v2020_v4 }
 0xec9   :  { %4427 = vmatprep.mubr.msk.f32.mxu1 %vm246_vm4, %v5357_v6 }
 0xf7c   :  { %v3945_v5 = vpop.f32.mrf.mxu1  ;;  %v4415_v7 = vpop.f32.mrf.mxu0 }
 0xf7e   :  { %v3946_v27 = vpop.f32.mrf.mxu1  ;;  %v2229_v9 = vpop.f32.mrf.mxu0 }
 0xf7f   :  { %v3947_v62 = vadd.f32 %v3946_v27, %v3945_v5 }
 0xf80   :  { %v3948_v8 = vpop.f32.mrf.mxu1  ;;  %v4418_v17 = vpop.f32.mrf.mxu0 }
 0xf81   :  { %v2230_v37 = vadd.f32 %v3947_v62, %v2229_v9  ;;  %v3625_v62 = vld [vmem:[%s5957_s1 + $0x940] sm:$0xff] }
 0xf82   :  { %v3949_v28 = vpop.f32.mrf.mxu1  ;;  %v2239_v61 = vpop.f32.mrf.mxu0 }
 0xf83   :  { %v3950_v58 = vadd.f32 %v3949_v28, %v3948_v8  ;;  %v2264_v45 = vsel %vm535_vm8, %v2230_v37, %v2253_v44  ;;  %v3619_v37 = vld [vmem:[%s5957_s1 + $0x910] sm:$0xff] }
 0xf84   :  { %v3951_v12 = vpop.f32.mrf.mxu1  ;;  %v3639_v44 = vld [vmem:[%s5957_s1 + $0x9b0] sm:$0xff] }
 0xf85   :  { %v2235_v35 = vadd.f32 %v4415_v7, %v3950_v58  ;;  %v3629_v58 = vld [vmem:[%s5957_s1 + $0x960] sm:$0xff] }
 0xf86   :  { %v3952_v13 = vpop.f32.mrf.mxu1 }
 0xf87   :  { %v3953_v23 = vadd.f32 %v3952_v13, %v3951_v12  ;;  %v2265_v42 = vsel %vm535_vm8, %v2235_v35, %v2255_v40  ;;  %v3621_v35 = vld [vmem:[%s5957_s1 + $0x920] sm:$0xff] }
 0xf88   :  { %v3954_v20 = vpop.f32.mrf.mxu1  ;;  %v3617_v40 = vld [vmem:[%s5957_s1 + $0x900] sm:$0xff] }
 0xf89   :  { %v2240_v63 = vadd.f32 %v3953_v23, %v2239_v61  ;;  %v3631_v23 = vld [vmem:[%s5957_s1 + $0x970] sm:$0xff]  ;;  %v3626_v61 = vld [vmem:[%s5957_s1 + $0x948] sm:$0xff] }
 0xf8a   :  { %v3955_v33 = vpop.f32.mrf.mxu1 }
 0xf8b   :  { %v3956_v59 = vadd.f32 %v3955_v33, %v3954_v20  ;;  %v2266_v38 = vsel %vm535_vm8, %v2240_v63, %v2257_v1  ;;  %v3632_v20 = vld [vmem:[%s5957_s1 + $0x978] sm:$0xff]  ;;  %v3630_v33 = vld [vmem:[%s5957_s1 + $0x968] sm:$0xff] }
 0xf8c   :  { %v3624_v63 = vld [vmem:[%s5957_s1 + $0x938] sm:$0xff]  ;;  %v3622_v1 = vld [vmem:[%s5957_s1 + $0x928] sm:$0xff] }
 0xf8d   :  { %v2245_v0 = vadd.f32 %v4418_v17, %v3956_v59  ;;  %v3628_v59 = vld [vmem:[%s5957_s1 + $0x958] sm:$0xff] }
 0xf8f   :  { %v2267_v36 = vsel %vm535_vm8, %v2245_v0, %v2259_v60  ;;  %v3627_v60 = vld [vmem:[%s5957_s1 + $0x950] sm:$0xff] }
 0xf90   :  { %4419 = vmatprep.subr.msk.mxu1 %vm271_vm5, %v2267_v36  ;;  %v3623_v0 = vld [vmem:[%s5957_s1 + $0x930] sm:$0xff] }
 0xf91   :  { %4420 = vmatpush3.msk.msra.mxu1 %vm271_vm5, %v2267_v36  ;;  %v3620_v36 = vld [vmem:[%s5957_s1 + $0x918] sm:$0xff] }
 0xf92   :  { %4421 = vmatprep.subr.mxu1 %v2266_v38 }
 0xf93   :  { %4422 = vmatpush3.msra.mxu1 %v2266_v38  ;;  %v3618_v38 = vld [vmem:[%s5957_s1 + $0x908] sm:$0xff] }
 0xf94   :  { %4423 = vmatprep.subr.mxu1 %v2265_v42 }
 0xf95   :  { %4424 = vmatpush3.msra.mxu1 %v2265_v42  ;;  %v3640_v42 = vld [vmem:[%s5957_s1 + $0x9b8] sm:$0xff] }
 0xf96   :  { %4425 = vmatprep.subr.mxu1 %v2264_v45 }
 0xf97   :  { %4426 = vmatpush3.msra.mxu1 %v2264_v45  ;;  %v3638_v45 = vld [vmem:[%s5957_s1 + $0x9a8] sm:$0xff] }
 0xf98   :  { %4428 = vmatmul.mubr.msk.f32.vlgmr.msra.gmra.mxu1 %vm246_vm4, %v5370_v47  ;;  %2538 = vmatprep.subr.mxu1 %v4638_v52 }
 0xf99   :  { %4430 = vmatprep.mubr.msk.f32.mxu1 %vm246_vm4, %v5377_v48  ;;  %2539 = vmatpush1.msra.mxu1 %v3632_v20 }
 0xf9a   :  { %2540 = vmatprep.subr.mxu1 %v4638_v52 }
 0xf9b   :  { %2541 = vmatpush1.msra.mxu1 %v3631_v23 }
 0xf9c   :  { %4431 = vmatmul.mubr.msk.f32.gmra.mxu1 %vm246_vm4, %v5384_v49  ;;  %2542 = vmatprep.subr.mxu1 %v4638_v52 }
 0xf9d   :  { %4433 = vmatprep.mubr.msk.f32.mxu1 %vm246_vm4, %v5391_v50  ;;  %2543 = vmatpush1.msra.mxu1 %v3630_v33 }
 0xf9e   :  { %2544 = vmatprep.subr.mxu1 %v4638_v52 }
 0xf9f   :  { %2545 = vmatpush1.msra.mxu1 %v3629_v58 }
 0xfa0   :  { %4434 = vmatmul.mubr.msk.f32.gmra.mxu1 %vm246_vm4, %v5398_v51  ;;  %2546 = vmatprep.subr.mxu1 %v4638_v52 }
 0xfa1   :  { %4436 = vmatprep.mubr.msk.f32.mxu1 %vm246_vm4, %v5405_v54  ;;  %2547 = vmatpush1.msra.mxu1 %v3628_v59 }
 0xfa2   :  { %2548 = vmatprep.subr.mxu1 %v4638_v52 }
 0xfa3   :  { %2549 = vmatpush1.msra.mxu1 %v3627_v60 }
 0xfa4   :  { %4437 = vmatmul.mubr.msk.f32.gmra.mxu1 %vm246_vm4, %v5412_v55  ;;  %2550 = vmatprep.subr.mxu1 %v4638_v52 }
 0xfa5   :  { %2551 = vmatpush1.msra.mxu1 %v3626_v61 }
 0xfa6   :  { %2552 = vmatprep.subr.mxu1 %v4638_v52 }
 0xfa7   :  { %2553 = vmatpush1.msra.mxu1 %v3625_v62 }
 0xfa8   :  { %2554 = vmatprep.subr.mxu1 %v4638_v52 }
 0xfa9   :  { %2555 = vmatpush1.msra.mxu1 %v3624_v63 }
 0xfaa   :  { %2556 = vmatprep.subr.mxu1 %v4638_v52 }
 0xfab   :  { %2557 = vmatpush1.msra.mxu1 %v3623_v0 }
 0xfac   :  { %2558 = vmatprep.subr.mxu1 %v4638_v52 }
 0xfad   :  { %2559 = vmatpush1.msra.mxu1 %v3622_v1 }
 0xfae   :  { %2560 = vmatprep.subr.mxu1 %v4638_v52 }
 0xfaf   :  { %2561 = vmatpush1.msra.mxu1 %v3621_v35 }
 0xfb0   :  { %2562 = vmatprep.subr.mxu1 %v4638_v52 }
 0xfb1   :  { %2563 = vmatpush1.msra.mxu1 %v3620_v36 }
 0xfb2   :  { %2564 = vmatprep.subr.mxu1 %v4638_v52 }
 0xfb3   :  { %2565 = vmatpush1.msra.mxu1 %v3619_v37 }
 0xfb4   :  { %2566 = vmatprep.subr.mxu1 %v4638_v52 }
 0xfb5   :  { %2567 = vmatpush1.msra.mxu1 %v3618_v38 }
 0xfb6   :  { %2568 = vmatprep.subr.mxu1 %v4638_v52 }
 0xfb7   :  { %2569 = vmatpush1.msra.mxu1 %v3617_v40 }
 0xfb8   :  { %2586 = vmatprep.subr.mxu1 %v4638_v52 }
 0xfb9   :  { %2587 = vmatpush2.msra.mxu1 %v3640_v42 }
 0xfba   :  { %2588 = vmatprep.subr.mxu1 %v4638_v52 }
 0xfbb   :  { %2589 = vmatpush2.msra.mxu1 %v3639_v44 }
 0xfbc   :  { %2590 = vmatprep.subr.mxu1 %v4638_v52 }
 0xfbd   :  { %2591 = vmatpush2.msra.mxu1 %v3638_v45 }
 0xfbe   :  { %2592 = vmatprep.subr.mxu1 %v4638_v52 }
0x1058   :  { %v4429_v53 = vpop.f32.mrf.mxu1 }
0x1059   :  { %v2377_v13 = vmax.f32 %v4429_v53, 0.0  ;;  %v3637_v53 = vld [vmem:[%s5957_s1 + $0x9a0] sm:$0xff] }
0x105a   :  { %v2337_v56 = vpop.f32.mrf.mxu1  ;;  %2593 = vmatpush2.msra.mxu1 %v3637_v53 }
0x105b   :  { %v2376_v17 = vmax.f32 %v2337_v56, 0.0  ;;  %v3636_v56 = vld [vmem:[%s5957_s1 + $0x998] sm:$0xff]  ;;  %2594 = vmatprep.subr.mxu1 %v4638_v52 }
0x105c   :  { %v4432_v57 = vpop.f32.mrf.mxu1  ;;  %2595 = vmatpush2.msra.mxu1 %v3636_v56 }
0x105d   :  { %v2379_v9 = vmax.f32 %v4432_v57, 0.0  ;;  %v3635_v57 = vld [vmem:[%s5957_s1 + $0x990] sm:$0xff]  ;;  %2596 = vmatprep.subr.mxu1 %v4638_v52 }
0x105e   :  { %v2347_v34 = vpop.f32.mrf.mxu1  ;;  %2597 = vmatpush2.msra.mxu1 %v3635_v57 }
0x105f   :  { %v2378_v12 = vmax.f32 %v2347_v34, 0.0  ;;  %2598 = vmatprep.subr.mxu1 %v4638_v52  ;;  %v3634_v34 = vld [vmem:[%s5957_s1 + $0x988] sm:$0xff] }
0x1060   :  { %v4435_v22 = vpop.f32.mrf.mxu1  ;;  %2599 = vmatpush2.msra.mxu1 %v3634_v34 }
0x1061   :  { %v2381_v8 = vmax.f32 %v4435_v22, 0.0  ;;  %2600 = vmatprep.subr.mxu1 %v4638_v52  ;;  %v3633_v22 = vld [vmem:[%s5957_s1 + $0x980] sm:$0xff] }
0x1062   :  { %v2357_v18 = vpop.f32.mrf.mxu1  ;;  %2601 = vmatpush2.msra.mxu1 %v3633_v22 }
0x1063   :  { %v2380_v28 = vmax.f32 %v2357_v18, 0.0 }
0x1064   :  { %v4438_v4 = vpop.f32.mrf.mxu1 }
0x1065   :  { %v2383_v5 = vmax.f32 %v4438_v4, 0.0 }
0x1066   :  { %v2367_v27 = vpop.f32.mrf.mxu1 }
0x1067   :  { %v2382_v7 = vmax.f32 %v2367_v27, 0.0  ;;  %4439 = vmatprep.subr.mxu0 %v2383_v5 }
0x1068   :  { %4440 = vmatpush3.msra.mxu0 %v2383_v5 }
0x1069   :  { %4441 = vmatprep.subr.mxu0 %v2382_v7 }
0x106a   :  { %4442 = vmatpush3.msra.mxu0 %v2382_v7 }
0x106b   :  { %4443 = vmatprep.subr.mxu0 %v2381_v8 }
0x106c   :  { %4444 = vmatpush3.msra.mxu0 %v2381_v8 }
0x106d   :  { %4445 = vmatprep.subr.mxu0 %v2380_v28 }
0x106e   :  { %4446 = vmatpush3.msra.mxu0 %v2380_v28 }
0x106f   :  { %4447 = vmatprep.subr.mxu0 %v2379_v9 }
0x1070   :  { %4448 = vmatpush3.msra.mxu0 %v2379_v9 }
0x1071   :  { %4449 = vmatprep.subr.mxu0 %v2378_v12 }
0x1072   :  { %4450 = vmatpush3.msra.mxu0 %v2378_v12 }
0x1073   :  { %4451 = vmatprep.subr.mxu0 %v2377_v13 }
0x1074   :  { %4452 = vmatpush3.msra.mxu0 %v2377_v13 }
0x1075   :  { %4453 = vmatprep.subr.mxu0 %v2376_v17 }
0x1076   :  { %4454 = vmatpush3.msra.mxu0 %v2376_v17 }
0x1077   :  { %4456 = vmatmul.mubr.msk.f32.vlgmr.msra.gmra.mxu0 %vm388_vm6, %v5503_v2 }
0x1078   :  { %4458 = vmatprep.mubr.msk.f32.mxu0 %vm388_vm6, %v5510_v3 }
0x107b   :  { %4459 = vmatmul.mubr.msk.f32.gmra.mxu0 %vm388_vm6, %v5523_v24 }
0x107c   :  { %4469 = vmatprep.mubr.msk.f32.mxu0 %vm246_vm4, %v5357_v6 }
0x1137   :  { %v4457_v18 = vpop.f32.mrf.mxu0 }
0x1138   :  { %v2474_v4 = vmul.f32 %v4457_v18, %v4688_v14  ;;  %v2478_v17 = vmul.f32 %v4457_v18, %v4690_v15 }
0x1139   :  { %v2450_v5 = vpop.f32.mrf.mxu0 }
0x113a   :  { %v2473_v27 = vmul.f32 %v2450_v5, %v4682_v11  ;;  %v2477_v7 = vmul.f32 %v2450_v5, %v4680_v10  ;;  %2487 = vrot.lane.b32.xlu1 %v2474_v4, %s4637_s12  ;;  %v2469_v12 = vmul.f32 %v2450_v5, %v4713_v29 }
0x113b   :  { %v4460_v8 = vpop.f32.mrf.mxu0 }
0x113c   :  { %v2476_v28 = vmul.f32 %v4460_v8, %v4702_v21  ;;  %3641 = vmatprep.mubr.msk.f32.mxu1 %vm388_vm6, %v2477_v7  ;;  %2485 = vrot.lane.b32.xlu0 %v2473_v27, %s4637_s12  ;;  %v2480_v58 = vmul.f32 %v4460_v8, %v4709_v26  ;;  %v2472_v61 = vmul.f32 %v4460_v8, %v4719_v32 }
0x113d   :  { %v2460_v52 = vpop.f32.mrf.mxu0 }
0x113e   :  { %v2475_v9 = vmul.f32 %v2460_v52, %v4697_v19  ;;  %2491 = vrot.lane.b32.xlu1 %v2476_v28, %s4637_s12 }
0x1140   :  { %2489 = vrot.lane.b32.xlu0 %v2475_v9, %s4637_s12  ;;  %v3668_v9 = vld [vmem:[%s5957_s1 + $0xad0] sm:$0xff] }
0x1142   :  { %2631 = vrot.lane.b32.xlu1 %v4860_v46, %s4635_s14  ;;  %v2470_v46 = vmul.f32 %v4457_v18, %v4717_v31 }
0x1144   :  { %2633 = vrot.lane.b32.xlu0 %v4852_v43, %s4635_s14  ;;  %v2479_v43 = vmul.f32 %v2460_v52, %v4707_v25 }
0x1146   :  { %2627 = vrot.lane.b32.xlu1 %v4847_v41, %s4635_s14 }
0x1148   :  { %2629 = vrot.lane.b32.xlu0 %v4843_v39, %s4635_s14  ;;  %v2471_v39 = vmul.f32 %v2460_v52, %v4715_v30  ;;  %v3669_v52 = vld [vmem:[%s5957_s1 + $0xad8] sm:$0xff] }
0x11ac   :  { %v2488_v23 = vpop.permute.xlu1 %2487 }
0x11ad   :  { %v2498_v41 = vsel %vm388_vm6, %v2470_v46, %v2488_v23  ;;  %v3663_v23 = vld [vmem:[%s5957_s1 + $0xaa8] sm:$0xff]  ;;  %v3662_v46 = vld [vmem:[%s5957_s1 + $0xaa0] sm:$0xff] }
0x11ae   :  { %v2486_v13 = vpop.permute.xlu0 %2485 }
0x11af   :  { %v2497_v20 = vsel %vm388_vm6, %v2469_v12, %v2486_v13  ;;  %v3667_v12 = vld [vmem:[%s5957_s1 + $0xac8] sm:$0xff]  ;;  %v3666_v13 = vld [vmem:[%s5957_s1 + $0xac0] sm:$0xff] }
0x11b0   :  { %2603 = vmatmul.mubr.f32.vlgmr.msra.gmra.mxu1 %v2497_v20  ;;  %v2492_v60 = vpop.permute.xlu1 %2491  ;;  %v3664_v20 = vld [vmem:[%s5957_s1 + $0xab0] sm:$0xff] }
0x11b1   :  { %3642 = vmatprep.mubr.msk.f32.mxu1 %vm388_vm6, %v2478_v17  ;;  %v2500_v62 = vsel %vm388_vm6, %v2472_v61, %v2492_v60  ;;  %v3665_v17 = vld [vmem:[%s5957_s1 + $0xab8] sm:$0xff] }
0x11b2   :  { %v2490_v33 = vpop.permute.xlu0 %2489 }
0x11b3   :  { %v2499_v59 = vsel %vm388_vm6, %v2471_v39, %v2490_v33  ;;  %v3659_v33 = vld [vmem:[%s5957_s1 + $0xa88] sm:$0xff]  ;;  %v3658_v39 = vld [vmem:[%s5957_s1 + $0xa80] sm:$0xff] }
0x11b4   :  { %2608 = vmatmul.mubr.f32.gmra.mxu1 %v2498_v41  ;;  %v2632_v40 = vpop.permute.xlu1 %2631  ;;  %v3660_v41 = vld [vmem:[%s5957_s1 + $0xa90] sm:$0xff] }
0x11b5   :  { %3643 = vmatprep.mubr.msk.f32.mxu1 %vm388_vm6, %v2479_v43  ;;  %v3661_v43 = vld [vmem:[%s5957_s1 + $0xa98] sm:$0xff] }
0x11b6   :  { %v2634_v37 = vpop.permute.xlu0 %2633 }
0x11b8   :  { %2613 = vmatmul.mubr.f32.gmra.mxu1 %v2499_v59  ;;  %v2628_v57 = vpop.permute.xlu1 %2627 }
0x11b9   :  { %3644 = vmatprep.mubr.msk.f32.mxu1 %vm388_vm6, %v2480_v58 }
0x11ba   :  { %v2630_v56 = vpop.permute.xlu0 %2629 }
0x11bc   :  { %2618 = vmatmul.mubr.f32.gmra.mxu1 %v2500_v62 }
0x11bd   :  { %4541 = vmatprep.mubr.msk.f32.mxu1 %vm246_vm4, %v5357_v6 }
0x1270   :  { %v2604_v63 = vpop.f32.mrf.mxu1 }
0x1271   :  { %v2639_v34 = vsel %vm530_vm7, %v2604_v63, %v2628_v57 }
0x1272   :  { %v2606_v0 = vpop.f32.mrf.mxu1 }
0x1274   :  { %v2609_v1 = vpop.f32.mrf.mxu1 }
0x1275   :  { %v2640_v6 = vsel %vm530_vm7, %v2609_v1, %v2630_v56 }
0x1276   :  { %v2611_v35 = vpop.f32.mrf.mxu1 }
0x1278   :  { %v2614_v36 = vpop.f32.mrf.mxu1 }
0x1279   :  { %v2641_v53 = vsel %vm530_vm7, %v2614_v36, %v2632_v40 }
0x127a   :  { %v2616_v38 = vpop.f32.mrf.mxu1 }
0x127c   :  { %v2619_v42 = vpop.f32.mrf.mxu1 }
0x127d   :  { %v2642_v44 = vsel %vm530_vm7, %v2619_v42, %v2634_v37 }
0x127e   :  { %v2621_v45 = vpop.f32.mrf.mxu1  ;;  %4461 = vmatprep.subr.msk.mxu0 %vm271_vm5, %v2642_v44 }
0x127f   :  { %4462 = vmatpush3.msk.msra.mxu0 %vm271_vm5, %v2642_v44 }
0x1280   :  { %4463 = vmatprep.subr.mxu0 %v2641_v53 }
0x1281   :  { %4464 = vmatpush3.msra.mxu0 %v2641_v53 }
0x1282   :  { %4465 = vmatprep.subr.mxu0 %v2640_v6 }
0x1283   :  { %4466 = vmatpush3.msra.mxu0 %v2640_v6 }
0x1284   :  { %4467 = vmatprep.subr.mxu0 %v2639_v34 }
0x1285   :  { %4468 = vmatpush3.msra.mxu0 %v2639_v34 }
0x1286   :  { %4470 = vmatmul.mubr.msk.f32.vlgmr.msra.gmra.mxu0 %vm246_vm4, %v5370_v47 }
0x1287   :  { %4472 = vmatprep.mubr.msk.f32.mxu0 %vm246_vm4, %v5377_v48 }
0x128a   :  { %4473 = vmatmul.mubr.msk.f32.gmra.mxu0 %vm246_vm4, %v5384_v49 }
0x128b   :  { %4475 = vmatprep.mubr.msk.f32.mxu0 %vm246_vm4, %v5391_v50 }
0x128e   :  { %4476 = vmatmul.mubr.msk.f32.gmra.mxu0 %vm246_vm4, %v5398_v51 }
0x128f   :  { %4478 = vmatprep.mubr.msk.f32.mxu0 %vm246_vm4, %v5405_v54 }
0x1292   :  { %4479 = vmatmul.mubr.msk.f32.gmra.mxu0 %vm246_vm4, %v5412_v55 }
0x1293   :  { %4497 = vmatprep.mubr.msk.f32.mxu0 %vm388_vm6, %v5347_v16 }
0x1346   :  { %v4471_v47 = vpop.f32.mrf.mxu0 }
0x1347   :  { %v2752_v8 = vmax.f32 %v4471_v47, 0.0 }
0x1348   :  { %v2712_v48 = vpop.f32.mrf.mxu0 }
0x1349   :  { %v2751_v28 = vmax.f32 %v2712_v48, 0.0 }
0x134a   :  { %v4474_v22 = vpop.f32.mrf.mxu0 }
0x134b   :  { %v2754_v55 = vmax.f32 %v4474_v22, 0.0 }
0x134c   :  { %v2722_v18 = vpop.f32.mrf.mxu0 }
0x134d   :  { %v2753_v16 = vmax.f32 %v2722_v18, 0.0 }
0x134e   :  { %v4477_v49 = vpop.f32.mrf.mxu0 }
0x134f   :  { %v2756_v51 = vmax.f32 %v4477_v49, 0.0 }
0x1350   :  { %v2732_v4 = vpop.f32.mrf.mxu0 }
0x1351   :  { %v2755_v54 = vmax.f32 %v2732_v4, 0.0 }
0x1352   :  { %v4480_v5 = vpop.f32.mrf.mxu0 }
0x1353   :  { %v2758_v50 = vmax.f32 %v4480_v5, 0.0 }
0x1354   :  { %v2742_v27 = vpop.f32.mrf.mxu0 }
0x1355   :  { %v2757_v7 = vmax.f32 %v2742_v27, 0.0  ;;  %4481 = vmatprep.subr.mxu0 %v2758_v50 }
0x1356   :  { %4482 = vmatpush3.msra.mxu0 %v2758_v50 }
0x1357   :  { %4483 = vmatprep.subr.mxu0 %v2757_v7 }
0x1358   :  { %4484 = vmatpush3.msra.mxu0 %v2757_v7 }
0x1359   :  { %4485 = vmatprep.subr.mxu0 %v2756_v51 }
0x135a   :  { %4486 = vmatpush3.msra.mxu0 %v2756_v51 }
0x135b   :  { %4487 = vmatprep.subr.mxu0 %v2755_v54 }
0x135c   :  { %4488 = vmatpush3.msra.mxu0 %v2755_v54  ;;  %v4622_v54 = vld [vmem:[%s5956_s2] sm:$0xff] }
0x135d   :  { %4489 = vmatprep.subr.mxu0 %v2754_v55 }
0x135e   :  { %4490 = vmatpush3.msra.mxu0 %v2754_v55 }
0x135f   :  { %4491 = vmatprep.subr.mxu0 %v2753_v16 }
0x1360   :  { %4492 = vmatpush3.msra.mxu0 %v2753_v16 }
0x1361   :  { %4493 = vmatprep.subr.mxu0 %v2752_v8 }
0x1362   :  { %4494 = vmatpush3.msra.mxu0 %v2752_v8 }
0x1363   :  { %4495 = vmatprep.subr.mxu0 %v2751_v28 }
0x1364   :  { %4496 = vmatpush3.msra.mxu0 %v2751_v28 }
0x1365   :  { %4498 = vmatmul.mubr.msk.f32.vlgmr.msra.gmra.mxu0 %vm388_vm6, %v5503_v2  ;;  %4503 = vmatprep.subr.mxu0 %v3669_v52 }
0x1366   :  { %4500 = vmatprep.mubr.msk.f32.mxu0 %vm388_vm6, %v5510_v3  ;;  %4504 = vmatpush3.msra.mxu0 %v3669_v52  ;;  %v4623_v52 = vld [vmem:[%s5956_s2 + $0x48] sm:$0xff] }
0x1367   :  { %4505 = vmatprep.subr.mxu0 %v3668_v9 }
0x1368   :  { %4506 = vmatpush3.msra.mxu0 %v3668_v9  ;;  %v4624_v9 = vld [vmem:[%s5956_s2 + $0x50] sm:$0xff] }
0x1369   :  { %4501 = vmatmul.mubr.msk.f32.gmra.mxu0 %vm388_vm6, %v5523_v24  ;;  %4507 = vmatprep.subr.mxu0 %v3667_v12 }
0x136a   :  { %4508 = vmatpush3.msra.mxu0 %v3667_v12  ;;  %v4625_v12 = vld [vmem:[%s5956_s2 + $0x58] sm:$0xff] }
0x136b   :  { %4509 = vmatprep.subr.mxu0 %v3666_v13 }
0x136c   :  { %4510 = vmatpush3.msra.mxu0 %v3666_v13  ;;  %v4626_v13 = vld [vmem:[%s5956_s2 + $0x60] sm:$0xff] }
0x136d   :  { %4511 = vmatprep.subr.mxu0 %v3665_v17 }
0x136e   :  { %4512 = vmatpush3.msra.mxu0 %v3665_v17  ;;  %v4627_v17 = vld [vmem:[%s5956_s2 + $0x68] sm:$0xff] }
0x136f   :  { %4513 = vmatprep.subr.mxu0 %v3664_v20 }
0x1370   :  { %4514 = vmatpush3.msra.mxu0 %v3664_v20  ;;  %v4628_v20 = vld [vmem:[%s5956_s2 + $0x70] sm:$0xff] }
0x1371   :  { %4515 = vmatprep.subr.mxu0 %v3663_v23 }
0x1372   :  { %4516 = vmatpush3.msra.mxu0 %v3663_v23  ;;  %v4629_v23 = vld [vmem:[%s5956_s2 + $0x78] sm:$0xff] }
0x1373   :  { %4517 = vmatprep.subr.mxu0 %v3662_v46 }
0x1374   :  { %4518 = vmatpush3.msra.mxu0 %v3662_v46 }
0x1375   :  { %4519 = vmatprep.subr.mxu0 %v3661_v43 }
0x1376   :  { %4520 = vmatpush3.msra.mxu0 %v3661_v43 }
0x1377   :  { %4521 = vmatprep.subr.mxu0 %v3660_v41 }
0x1378   :  { %4522 = vmatpush3.msra.mxu0 %v3660_v41 }
0x1379   :  { %4523 = vmatprep.subr.mxu0 %v3659_v33 }
0x137a   :  { %4524 = vmatpush3.msra.mxu0 %v3659_v33 }
0x137b   :  { %4525 = vmatprep.subr.mxu0 %v3658_v39 }
0x137c   :  { %4526 = vmatpush3.msra.mxu0 %v3658_v39 }
0x1425   :  { %v4499_v58 = vpop.f32.mrf.mxu0 }
0x1426   :  { %v2849_v59 = vmul.f32 %v4499_v58, %v4688_v14  ;;  %v2853_v63 = vmul.f32 %v4499_v58, %v4690_v15  ;;  %v2845_v53 = vmul.f32 %v4499_v58, %v4717_v31 }
0x1427   :  { %v2825_v60 = vpop.f32.mrf.mxu0 }
0x1428   :  { %v2848_v61 = vmul.f32 %v2825_v60, %v4682_v11  ;;  %2862 = vrot.lane.b32.xlu1 %v2849_v59, %s4636_s15  ;;  %v2852_v0 = vmul.f32 %v2825_v60, %v4680_v10  ;;  %v2844_v44 = vmul.f32 %v2825_v60, %v4713_v29 }
0x1429   :  { %v4502_v62 = vpop.f32.mrf.mxu0 }
0x142a   :  { %2860 = vrot.lane.b32.xlu0 %v2848_v61, %s4636_s15  ;;  %v2851_v35 = vmul.f32 %v4502_v62, %v4702_v21  ;;  %v2855_v37 = vmul.f32 %v4502_v62, %v4709_v26  ;;  %v2847_v49 = vmul.f32 %v4502_v62, %v4719_v32 }
0x142b   :  { %v2835_v1 = vpop.f32.mrf.mxu0 }
0x142c   :  { %2878 = vrot.lane.b32.xlu1 %v2853_v63, %s4637_s12  ;;  %v2850_v36 = vmul.f32 %v2835_v1, %v4697_v19  ;;  %v2854_v38 = vmul.f32 %v2835_v1, %v4707_v25  ;;  %v2846_v18 = vmul.f32 %v2835_v1, %v4715_v30 }
0x142e   :  { %2876 = vrot.lane.b32.xlu0 %v2852_v0, %s4637_s12 }
0x1430   :  { %2866 = vrot.lane.b32.xlu1 %v2851_v35, %s4636_s15 }
0x1432   :  { %2864 = vrot.lane.b32.xlu0 %v2850_v36, %s4636_s15 }
0x1434   :  { %2882 = vrot.lane.b32.xlu1 %v2855_v37, %s4637_s12 }
0x1436   :  { %2880 = vrot.lane.b32.xlu0 %v2854_v38, %s4637_s12  ;;  %v3692_v38 = vld [vmem:[%s5957_s1 + $0xc28] sm:$0xff] }
0x149a   :  { %v2863_v40 = vpop.permute.xlu1 %2862 }
0x149b   :  { %v2889_v57 = vsel %vm535_vm8, %v2845_v53, %v2863_v40  ;;  %v3691_v40 = vld [vmem:[%s5957_s1 + $0xc20] sm:$0xff] }
0x149c   :  { %v2861_v42 = vpop.permute.xlu0 %2860 }
0x149d   :  { %v2888_v56 = vsel %vm535_vm8, %v2844_v44, %v2861_v42  ;;  %v3687_v42 = vld [vmem:[%s5957_s1 + $0xc00] sm:$0xff] }
0x149e   :  { %v2879_v45 = vpop.permute.xlu1 %2878 }
0x149f   :  { %v2893_v47 = vsel %vm388_vm6, %v2889_v57, %v2879_v45 }
0x14a0   :  { %v2877_v6 = vpop.permute.xlu0 %2876 }
0x14a1   :  { %v2892_v34 = vsel %vm388_vm6, %v2888_v56, %v2877_v6 }
0x14a2   :  { %4527 = vmatprep.mubr.msk.f32.mxu0 %vm911_vm10, %v2892_v34  ;;  %v2867_v48 = vpop.permute.xlu1 %2866 }
0x14a3   :  { %4528 = vmatmul.mubr.msk.f32.vlgmr.msra.gmra.mxu0 %vm911_vm10, %v2893_v47  ;;  %v2891_v27 = vsel %vm535_vm8, %v2847_v49, %v2867_v48 }
0x14a4   :  { %v2865_v22 = vpop.permute.xlu0 %2864 }
0x14a5   :  { %v2890_v5 = vsel %vm535_vm8, %v2846_v18, %v2865_v22 }
0x14a6   :  { %v2883_v4 = vpop.permute.xlu1 %2882 }
0x14a7   :  { %v2895_v51 = vsel %vm388_vm6, %v2891_v27, %v2883_v4 }
0x14a8   :  { %v2881_v50 = vpop.permute.xlu0 %2880 }
0x14a9   :  { %v2894_v7 = vsel %vm388_vm6, %v2890_v5, %v2881_v50 }
0x14aa   :  { %4530 = vmatprep.mubr.msk.f32.mxu0 %vm911_vm10, %v2894_v7 }
0x14ab   :  { %4531 = vmatmul.mubr.msk.f32.gmra.mxu0 %vm911_vm10, %v2895_v51 }
0x14ac   :  { %4569 = vmatprep.mubr.msk.f32.mxu0 %vm388_vm6, %v4622_v54 }
0x1563   :  { %v4529_v55 = vpop.f32.mrf.mxu0 }
0x1565   :  { %v2987_v16 = vpop.f32.mrf.mxu0 }
0x156b   :  { %v4532_v8 = vpop.f32.mrf.mxu0 }
0x156c   :  { %4533 = vmatprep.subr.msk.mxu1 %vm271_vm5, %v4532_v8 }
0x156d   :  { %v2997_v28 = vpop.f32.mrf.mxu0  ;;  %4534 = vmatpush3.msk.msra.mxu1 %vm271_vm5, %v4532_v8 }
0x156e   :  { %4535 = vmatprep.subr.mxu1 %v2997_v28 }
0x156f   :  { %4536 = vmatpush3.msra.mxu1 %v2997_v28 }
0x1570   :  { %4537 = vmatprep.subr.mxu1 %v4529_v55 }
0x1571   :  { %4538 = vmatpush3.msra.mxu1 %v4529_v55 }
0x1572   :  { %4539 = vmatprep.subr.mxu1 %v2987_v16 }
0x1573   :  { %4540 = vmatpush3.msra.mxu1 %v2987_v16 }
0x1574   :  { %4542 = vmatmul.mubr.msk.f32.vlgmr.msra.gmra.mxu1 %vm246_vm4, %v4623_v52  ;;  %4575 = vmatprep.subr.mxu1 %v3692_v38 }
0x1575   :  { %4544 = vmatprep.mubr.msk.f32.mxu1 %vm246_vm4, %v4624_v9  ;;  %4576 = vmatpush3.msra.mxu1 %v3692_v38 }
0x1576   :  { %4577 = vmatprep.subr.mxu1 %v3691_v40 }
0x1577   :  { %4578 = vmatpush3.msra.mxu1 %v3691_v40 }
0x1578   :  { %4545 = vmatmul.mubr.msk.f32.gmra.mxu1 %vm246_vm4, %v4625_v12 }
0x1579   :  { %4547 = vmatprep.mubr.msk.f32.mxu1 %vm246_vm4, %v4626_v13 }
0x157c   :  { %4548 = vmatmul.mubr.msk.f32.gmra.mxu1 %vm246_vm4, %v4627_v17 }
0x157d   :  { %4550 = vmatprep.mubr.msk.f32.mxu1 %vm246_vm4, %v4628_v20 }
0x1580   :  { %4551 = vmatmul.mubr.msk.f32.gmra.mxu1 %vm246_vm4, %v4629_v23 }
0x1634   :  { %v4543_v46 = vpop.f32.mrf.mxu1 }
0x1635   :  { %v3115_v36 = vmax.f32 %v4543_v46, 0.0 }
0x1636   :  { %v3075_v43 = vpop.f32.mrf.mxu1 }
0x1637   :  { %v3114_v37 = vmax.f32 %v3075_v43, 0.0 }
0x1638   :  { %v4546_v41 = vpop.f32.mrf.mxu1 }
0x1639   :  { %v3117_v1 = vmax.f32 %v4546_v41, 0.0 }
0x163a   :  { %v3085_v33 = vpop.f32.mrf.mxu1 }
0x163b   :  { %v3116_v35 = vmax.f32 %v3085_v33, 0.0 }
0x163c   :  { %v4549_v39 = vpop.f32.mrf.mxu1 }
0x163d   :  { %v3119_v63 = vmax.f32 %v4549_v39, 0.0 }
0x163e   :  { %v3095_v58 = vpop.f32.mrf.mxu1 }
0x163f   :  { %v3118_v0 = vmax.f32 %v3095_v58, 0.0 }
0x1640   :  { %v4552_v59 = vpop.f32.mrf.mxu1 }
0x1641   :  { %v3121_v60 = vmax.f32 %v4552_v59, 0.0 }
0x1642   :  { %v3105_v61 = vpop.f32.mrf.mxu1 }
0x1643   :  { %v3120_v62 = vmax.f32 %v3105_v61, 0.0  ;;  %4553 = vmatprep.subr.mxu0 %v3121_v60 }
0x1644   :  { %4554 = vmatpush3.msra.mxu0 %v3121_v60 }
0x1645   :  { %4555 = vmatprep.subr.mxu0 %v3120_v62 }
0x1646   :  { %4556 = vmatpush3.msra.mxu0 %v3120_v62 }
0x1647   :  { %4557 = vmatprep.subr.mxu0 %v3119_v63 }
0x1648   :  { %4558 = vmatpush3.msra.mxu0 %v3119_v63 }
0x1649   :  { %4559 = vmatprep.subr.mxu0 %v3118_v0 }
0x164a   :  { %4560 = vmatpush3.msra.mxu0 %v3118_v0 }
0x164b   :  { %4561 = vmatprep.subr.mxu0 %v3117_v1 }
0x164c   :  { %4562 = vmatpush3.msra.mxu0 %v3117_v1 }
0x164d   :  { %4563 = vmatprep.subr.mxu0 %v3116_v35 }
0x164e   :  { %4564 = vmatpush3.msra.mxu0 %v3116_v35 }
0x164f   :  { %4565 = vmatprep.subr.mxu0 %v3115_v36 }
0x1650   :  { %4566 = vmatpush3.msra.mxu0 %v3115_v36 }
0x1651   :  { %4567 = vmatprep.subr.mxu0 %v3114_v37 }
0x1652   :  { %4568 = vmatpush3.msra.mxu0 %v3114_v37 }
0x1653   :  { %4570 = vmatmul.mubr.msk.f32.vlgmr.msra.gmra.mxu0 %vm388_vm6, %v5503_v2  ;;  %v3690_v2 = vld [vmem:[%s5957_s1 + $0xc18] sm:$0xff] }
0x1654   :  { %4572 = vmatprep.mubr.msk.f32.mxu0 %vm388_vm6, %v5510_v3  ;;  %4579 = vmatprep.subr.mxu1 %v3690_v2  ;;  %v3689_v3 = vld [vmem:[%s5957_s1 + $0xc10] sm:$0xff] }
0x1655   :  { %4580 = vmatpush3.msra.mxu1 %v3690_v2 }
0x1656   :  { %4581 = vmatprep.subr.mxu1 %v3689_v3 }
0x1657   :  { %4573 = vmatmul.mubr.msk.f32.gmra.mxu0 %vm388_vm6, %v5523_v24  ;;  %4582 = vmatpush3.msra.mxu1 %v3689_v3  ;;  %v3688_v24 = vld [vmem:[%s5957_s1 + $0xc08] sm:$0xff] }
0x1658   :  { %4583 = vmatprep.subr.mxu1 %v3688_v24 }
0x1659   :  { %4584 = vmatpush3.msra.mxu1 %v3688_v24 }
0x165a   :  { %4585 = vmatprep.subr.mxu1 %v3687_v42 }
0x165b   :  { %4586 = vmatpush3.msra.mxu1 %v3687_v42 }
0x1713   :  { %v4571_v44 = vpop.f32.mrf.mxu0 }
0x1714   :  { %v3212_v45 = vmul.f32 %v4571_v44, %v4688_v14  ;;  %v3216_v57 = vmul.f32 %v4571_v44, %v4690_v15  ;;  %v3208_v49 = vmul.f32 %v4571_v44, %v4717_v31 }
0x1715   :  { %v3188_v53 = vpop.f32.mrf.mxu0 }
0x1716   :  { %v3211_v56 = vmul.f32 %v3188_v53, %v4682_v11  ;;  %3225 = vrot.lane.b32.xlu1 %v3212_v45, %s4635_s14  ;;  %v3215_v34 = vmul.f32 %v3188_v53, %v4680_v10 }
0x1717   :  { %v4574_v6 = vpop.f32.mrf.mxu0 }
0x1718   :  { %3223 = vrot.lane.b32.xlu0 %v3211_v56, %s4635_s14  ;;  %v3214_v48 = vmul.f32 %v4574_v6, %v4702_v21  ;;  %v3218_v11 = vmul.f32 %v4574_v6, %v4709_v26  ;;  %v3207_v21 = vmul.f32 %v3188_v53, %v4713_v29  ;;  %v3210_v7 = vmul.f32 %v4574_v6, %v4719_v32 }
0x1719   :  { %v3198_v47 = vpop.f32.mrf.mxu0 }
0x171a   :  { %3241 = vrot.lane.b32.xlu1 %v3216_v57, %s4636_s15  ;;  %v3213_v14 = vmul.f32 %v3198_v47, %v4697_v19  ;;  %v3217_v15 = vmul.f32 %v3198_v47, %v4707_v25  ;;  %v3209_v29 = vmul.f32 %v3198_v47, %v4715_v30 }
0x171c   :  { %3239 = vrot.lane.b32.xlu0 %v3215_v34, %s4636_s15 }
0x171e   :  { %3229 = vrot.lane.b32.xlu1 %v3214_v48, %s4635_s14 }
0x1720   :  { %3227 = vrot.lane.b32.xlu0 %v3213_v14, %s4635_s14 }
0x1722   :  { %3245 = vrot.lane.b32.xlu1 %v3218_v11, %s4636_s15 }
0x1724   :  { %3243 = vrot.lane.b32.xlu0 %v3217_v15, %s4636_s15 }
0x1788   :  { %v3226_v10 = vpop.permute.xlu1 %3225 }
0x1789   :  { %v3252_v26 = vsel %vm530_vm7, %v3208_v49, %v3226_v10 }
0x178a   :  { %v3224_v22 = vpop.permute.xlu0 %3223 }
0x178b   :  { %v3251_v19 = vsel %vm530_vm7, %v3207_v21, %v3224_v22 }
0x178c   :  { %v3242_v18 = vpop.permute.xlu1 %3241 }
0x178d   :  { %v3256_v25 = vsel %vm535_vm8, %v3252_v26, %v3242_v18 }
0x178e   :  { %v3240_v4 = vpop.permute.xlu0 %3239 }
0x178f   :  { %v3255_v5 = vsel %vm535_vm8, %v3251_v19, %v3240_v4 }
0x1790   :  { %4587 = vmatprep.mubr.msk.f32.mxu1 %vm547_vm9, %v3255_v5  ;;  %v3230_v50 = vpop.permute.xlu1 %3229 }
0x1791   :  { %4588 = vmatmul.mubr.msk.f32.vlgmr.msra.gmra.mxu1 %vm547_vm9, %v3256_v25  ;;  %v3254_v55 = vsel %vm530_vm7, %v3210_v7, %v3230_v50 }
0x1792   :  { %v3228_v27 = vpop.permute.xlu0 %3227 }
0x1793   :  { %v3253_v51 = vsel %vm530_vm7, %v3209_v29, %v3228_v27 }
0x1794   :  { %v3246_v31 = vpop.permute.xlu1 %3245 }
0x1795   :  { %v3258_v8 = vsel %vm535_vm8, %v3254_v55, %v3246_v31 }
0x1796   :  { %v3244_v54 = vpop.permute.xlu0 %3243 }
0x1797   :  { %v3257_v16 = vsel %vm535_vm8, %v3253_v51, %v3244_v54 }
0x1798   :  { %4590 = vmatprep.mubr.msk.f32.mxu1 %vm547_vm9, %v3257_v16 }
0x1799   :  { %4591 = vmatmul.mubr.msk.f32.gmra.mxu1 %vm547_vm9, %v3258_v8 }
0x1851   :  { %v4589_v28 = vpop.f32.mrf.mxu1 }
0x1852   :  { %3364 = vst.msk [vmem:[%s5959_s3 + $0x8] sm:$0xff] %vm137_vm2, %v4589_v28 }
0x1853   :  { %v3344_v30 = vpop.f32.mrf.mxu1 }
0x1854   :  { %3363 = vst.msk [vmem:[%s5959_s3] sm:$0xff] %vm137_vm2, %v3344_v30 }
0x1859   :  { %v4592_v32 = vpop.f32.mrf.mxu1 }
0x185a   :  { %3367 = vst.msk [vmem:[%s5959_s3 + $0x18] sm:$0x3f] %vm3366_vm11, %v4592_v32 }
0x185b   :  { %v3354_v52 = vpop.f32.mrf.mxu1 }
0x185c   :  { %3365 = vst.msk [vmem:[%s5959_s3 + $0x10] sm:$0xff] %vm137_vm2, %v3354_v52 }

</bundles_post_ra>
